<compile_context>
chip_gen: v7x
topology: tpu7x:2x2x1
jax: 0.10.0
libtpu: 0.0.40
codegen_flags: <defaults>
</compile_context>

<pallas_src>
import jax
import jax.numpy as jnp
from jax.experimental import pallas as pl
from jax.experimental.pallas import tpu as pltpu


# ----------------------------------------------------------------------------
# Pallas kernels
# ----------------------------------------------------------------------------
def _conv_relu_pool_kernel(q_ref, w_ref, b_ref, o_ref):
    """Fused conv (matmul over im2col patches) + bias + ReLU + 2x2 maxpool.

    q: (4, K, TM) stacked im2col patches, one slab per 2x2 pool quadrant
    w: (C_out, K)        b: (C_out, 1)        o: (C_out, TM)

    relu(max_q(w @ p_q) + b) == maxpool2x2(relu(conv(x) + b)) because ReLU is
    monotone and the bias does not depend on the quadrant.
    """
    w = w_ref[...]
    m = jnp.dot(w, q_ref[0], preferred_element_type=jnp.float32)
    m = jnp.maximum(m, jnp.dot(w, q_ref[1], preferred_element_type=jnp.float32))
    m = jnp.maximum(m, jnp.dot(w, q_ref[2], preferred_element_type=jnp.float32))
    m = jnp.maximum(m, jnp.dot(w, q_ref[3], preferred_element_type=jnp.float32))
    o_ref[...] = jnp.maximum(m + b_ref[...], 0.0)


def _fc3_kernel(x_ref, w1_ref, b1_ref, w2_ref, b2_ref, w3_ref, b3_ref, o_ref):
    """Fused fc1+ReLU -> fc2+ReLU -> fc3 in a (features, batch) layout.

    x: (800, TN); w1: (120, 800); w2: (84, 120); w3: (10, 84); o: (10, TN).
    All intermediates stay in VMEM/vregs.
    """
    h = jnp.dot(w1_ref[...], x_ref[...], preferred_element_type=jnp.float32)
    h = jnp.maximum(h + b1_ref[...], 0.0)
    h = jnp.dot(w2_ref[...], h, preferred_element_type=jnp.float32)
    h = jnp.maximum(h + b2_ref[...], 0.0)
    o_ref[...] = (jnp.dot(w3_ref[...], h, preferred_element_type=jnp.float32)
                  + b3_ref[...])


# ----------------------------------------------------------------------------
# Tiling helpers / compiler params
# ----------------------------------------------------------------------------
def _choose_tile(m, max_tile_lanes):
    """Pad the lane dim up to a multiple of 128 and pick a lane-tile size.

    Returns (m_padded, tm): tm is a multiple of 128 that divides m_padded,
    tm <= max_tile_lanes, and there are >= 2 grid steps whenever
    m_padded >= 256 (lets v7x shard the "parallel" axis across both TCs).
    """
    m128 = -(-m // 128) * 128
    k = m128 // 128
    d_max = min(max(max_tile_lanes // 128, 1), k)
    if k >= 2:
        d_max = max(1, min(d_max, k // 2))       # guarantee >= 2 grid steps
    d = d_max
    while k % d:                                 # largest divisor <= d_max
        d -= 1
    if 4 * d < d_max:                            # pathological divisors: over-pad
        d = d_max
        k = -(-k // d) * d
    return 128 * k, 128 * d


_COMPILER_PARAMS = pltpu.CompilerParams(
    # Single M/batch grid axis, independent per step -> "parallel" so v7x can
    # shard grid steps across its two TensorCores (neutral on v5e/v6e).
    dimension_semantics=("parallel",),
    # 48 MiB: well above the default scoped limit, still safely inside v7x's
    # 64 MiB physical VMEM; per-layer tile caps keep the working set < 30 MiB.
    vmem_limit_bytes=48 * 1024 * 1024,
)


# ----------------------------------------------------------------------------
# Glue: pool-quadrant im2col, conv wrapper, FC wrapper, full forward
# ----------------------------------------------------------------------------
def _pool_quadrant_patches(x, kh, kw, batch_last):
    """x: (C, N, H, W) -> stacked quadrant patch tensor (4, C*kh*kw, M).

    Quadrant (a, b) slab holds, for every pooled output position, the im2col
    patch of conv output position (2*yp + a, 2*xp + b).  Row order is (c, i, j)
    flattened (matches the (C_out, C_in*kh*kw) weight reshape).  The lane (M)
    dim is ordered (n, yp, xp) when batch_last=False and (yp, xp, n) when
    batch_last=True.
    """
    C, N, H, W = x.shape
    Hp, Wp = (H - kh + 1) // 2, (W - kw + 1) // 2
    quads = []
    for a in range(2):
        for b in range(2):
            sl = [x[:, :, a + i: a + i + 2 * Hp: 2, b + j: b + j + 2 * Wp: 2]
                  for i in range(kh) for j in range(kw)]     # each (C, N, Hp, Wp)
            p = jnp.stack(sl, axis=1)                        # (C, kh*kw, N, Hp, Wp)
            if batch_last:
                p = p.transpose(0, 1, 3, 4, 2)               # (C, kh*kw, Hp, Wp, N)
            quads.append(p.reshape(C * kh * kw, -1))
    return jnp.stack(quads, axis=0), Hp, Wp                  # (4, K, M)


def conv_relu_pool(x_cnhw, w, b, *, batch_last_lanes, max_tile_lanes):
    """maxpool2x2(relu(Conv2d(x))) as a single fused Pallas kernel.

    x_cnhw: (C_in, N, H, W); w: (C_out, C_in, kh, kw); b: (C_out,).
    Returns ((C_out, M), Hp, Wp); lane order as in _pool_quadrant_patches.
    """
    C_in, N, H, W = x_cnhw.shape
    C_out, _, kh, kw = w.shape
    Ho, Wo = H - kh + 1, W - kw + 1
    # Fused-pool identity (and PyTorch floor-mode pooling) needs even dims.
    assert Ho % 2 == 0 and Wo % 2 == 0, "conv output H/W must be even"

    # TODO(synk): in-kernel implicit-GEMM patch extraction (raw NCHW tile in
    # VMEM + shifted dots) would cut HBM bytes further; kept as XLA glue here
    # to keep Mosaic lowering simple and robust.
    quads, Hp, Wp = _pool_quadrant_patches(x_cnhw, kh, kw, batch_last_lanes)

    K = C_in * kh * kw
    M = N * Hp * Wp
    M_pad, tm = _choose_tile(M, max_tile_lanes)
    if M_pad != M:
        quads = jnp.pad(quads, ((0, 0), (0, 0), (0, M_pad - M)))

    out = pl.pallas_call(
        _conv_relu_pool_kernel,
        out_shape=jax.ShapeDtypeStruct((C_out, M_pad), jnp.float32),
        grid=(M_pad // tm,),
        in_specs=[
            pl.BlockSpec((4, K, tm), lambda i: (0, 0, i)),   # one DMA stream/step
            pl.BlockSpec((C_out, K), lambda i: (0, 0)),      # resident weights
            pl.BlockSpec((C_out, 1), lambda i: (0, 0)),      # resident bias
        ],
        out_specs=pl.BlockSpec((C_out, tm), lambda i: (0, i)),
        compiler_params=_COMPILER_PARAMS,
    )(quads, w.reshape(C_out, K), b.reshape(C_out, 1))

    return out[:, :M], Hp, Wp


def fc_fused(x_fc, params, *, max_tile_lanes=4096):
    """fc3(relu(fc2(relu(fc1(x))))) as one Pallas kernel.

    x_fc: (800, N) features-major (PyTorch flatten order). Returns (N, 10).
    """
    d_in, N = x_fc.shape
    d1 = params["fc1_w"].shape[0]
    d2 = params["fc2_w"].shape[0]
    d3 = params["fc3_w"].shape[0]

    N_pad, tn = _choose_tile(N, max_tile_lanes)   # lane-dense stores at small N
    if N_pad != N:
        x_fc = jnp.pad(x_fc, ((0, 0), (0, N_pad - N)))

    col = lambda i: (0, i)
    rep = lambda i: (0, 0)
    out = pl.pallas_call(
        _fc3_kernel,
        out_shape=jax.ShapeDtypeStruct((d3, N_pad), jnp.float32),
        grid=(N_pad // tn,),
        in_specs=[
            pl.BlockSpec((d_in, tn), col),
            pl.BlockSpec((d1, d_in), rep), pl.BlockSpec((d1, 1), rep),
            pl.BlockSpec((d2, d1), rep), pl.BlockSpec((d2, 1), rep),
            pl.BlockSpec((d3, d2), rep), pl.BlockSpec((d3, 1), rep),
        ],
        out_specs=pl.BlockSpec((d3, tn), col),
        compiler_params=_COMPILER_PARAMS,
    )(x_fc,
      params["fc1_w"], params["fc1_b"].reshape(d1, 1),
      params["fc2_w"], params["fc2_b"].reshape(d2, 1),
      params["fc3_w"], params["fc3_b"].reshape(d3, 1))
    return out[:, :N].T                            # (N, 10)


def convnet_forward(params, x):
    """x: (N, 1, H, W) NCHW exactly like the PyTorch module. Returns (N, 10)."""
    N = x.shape[0]
    c1 = params["conv1_w"].shape[0]
    c2 = params["conv2_w"].shape[0]

    x = jnp.transpose(x, (1, 0, 2, 3))                          # (C_in=1, N, H, W)
    y, hp, wp = conv_relu_pool(x, params["conv1_w"], params["conv1_b"],
                               batch_last_lanes=False, max_tile_lanes=16384)
    y = y.reshape(c1, N, hp, wp)                                # (C,N,H,W) — no transpose
    y, hp, wp = conv_relu_pool(y, params["conv2_w"], params["conv2_b"],
                               batch_last_lanes=True, max_tile_lanes=4096)
    x_fc = y.reshape(c2 * hp * wp, N)                           # (800, N) — no transpose
    return fc_fused(x_fc, params)                               # (N, 10)


# ----------------------------------------------------------------------------
# Pure-JAX reference (for the built-in correctness check only)
# ----------------------------------------------------------------------------
def convnet_reference(params, x):
    dn = ("NCHW", "OIHW", "NCHW")
    hp = jax.lax.Precision.HIGHEST

    def pool(y):
        return jax.lax.reduce_window(y, -jnp.inf, jax.lax.max,
                                     (1, 1, 2, 2), (1, 1, 2, 2), "VALID")

    y = jax.lax.conv_general_dilated(x, params["conv1_w"], (1, 1), "VALID",
                                     dimension_numbers=dn, precision=hp)
    y = pool(jax.nn.relu(y + params["conv1_b"][None, :, None, None]))
    y = jax.lax.conv_general_dilated(y, params["conv2_w"], (1, 1), "VALID",
                                     dimension_numbers=dn, precision=hp)
    y = pool(jax.nn.relu(y + params["conv2_b"][None, :, None, None]))
    y = y.reshape(y.shape[0], -1)
    y = jax.nn.relu(jnp.dot(y, params["fc1_w"].T, precision=hp) + params["fc1_b"])
    y = jax.nn.relu(jnp.dot(y, params["fc2_w"].T, precision=hp) + params["fc2_b"])
    return jnp.dot(y, params["fc3_w"].T, precision=hp) + params["fc3_b"]


# ----------------------------------------------------------------------------
# Deterministic parameter init (PyTorch-default-style uniform(+-1/sqrt(fan_in)))
# ----------------------------------------------------------------------------
def init_params(key):
    ks = jax.random.split(key, 10)

    def u(k, shape, fan_in):
        bound = 1.0 / jnp.sqrt(fan_in)
        return jax.random.uniform(k, shape, jnp.float32, -bound, bound)

    return {
        "conv1_w": u(ks[0], (16, 1, 5, 5), 1 * 5 * 5),
        "conv1_b": u(ks[1], (16,), 1 * 5 * 5),
        "conv2_w": u(ks[2], (32, 16, 3, 3), 16 * 3 * 3),
        "conv2_b": u(ks[3], (32,), 16 * 3 * 3),
        "fc1_w":   u(ks[4], (120, 800), 800),
        "fc1_b":   u(ks[5], (120,), 800),
        "fc2_w":   u(ks[6], (84, 120), 120),
        "fc2_b":   u(ks[7], (84,), 120),
        "fc3_w":   u(ks[8], (10, 84), 84),
        "fc3_b":   u(ks[9], (10,), 84),
    }


if __name__ == "__main__":
    key = jax.random.PRNGKey(0)
    pkey, xkey = jax.random.split(key)
    params = init_params(pkey)

    # MNIST-style input: fc1's 32*5*5 implies a 28x28 single-channel input.
    x = jax.random.normal(xkey, (2, 1, 28, 28), jnp.float32)

    out = jax.jit(convnet_forward)(params, x)
    out = jax.block_until_ready(out)
    assert out.shape == (2, 10) and out.dtype == jnp.float32

    ref = convnet_reference(params, x)
    err = float(jnp.max(jnp.abs(out - ref)))
    assert err < 2e-3, f"Pallas vs reference mismatch: max abs err = {err}"

    print("KERNEL_OK")
</pallas_src>

<mosaic_0001>
module attributes {stable_mosaic.version = 11 : i64} {
  func.func @_conv_relu_pool_kernel(%arg0: i32, %arg1: memref<4x25x128xf32, #tpu.memory_space<vmem>>, %arg2: memref<16x25xf32, #tpu.memory_space<vmem>>, %arg3: memref<16x1xf32, #tpu.memory_space<vmem>>, %arg4: memref<16x128xf32, #tpu.memory_space<vmem>>) attributes {dimension_semantics = [#tpu.dimension_semantics<parallel>], iteration_bounds = array<i64: 3>, scalar_prefetch = 0 : i64, scratch_operands = 0 : i64, tpu.core_type = #tpu.core_type<tc>, window_params = [{transform_indices = @transform_0, window_bounds = array<i64: 4, 25, 128>}, {pipeline_mode = #tpu.pipeline_mode<synchronous>, transform_indices = @transform_1, window_bounds = array<i64: 16, 25>}, {pipeline_mode = #tpu.pipeline_mode<synchronous>, transform_indices = @transform_2, window_bounds = array<i64: 16, 1>}, {transform_indices = @transform_3, window_bounds = array<i64: 16, 128>}]} {
    %c0 = arith.constant 0 : index
    %c0_0 = arith.constant 0 : index
    %0 = vector.load %arg2[%c0, %c0_0] : memref<16x25xf32, #tpu.memory_space<vmem>>, vector<16x25xf32>
    %c0_1 = arith.constant 0 : index
    %c0_2 = arith.constant 0 : index
    %c0_3 = arith.constant 0 : index
    %1 = vector.load %arg1[%c0_1, %c0_2, %c0_3] : memref<4x25x128xf32, #tpu.memory_space<vmem>>, vector<1x25x128xf32>
    %2 = vector.shape_cast %1 : vector<1x25x128xf32> to vector<25x128xf32>
    %cst = arith.constant dense<0.000000e+00> : vector<16x128xf32>
    %3 = tpu.matmul %0, %2, %cst {dimension_numbers = #tpu.dot_dimension_numbers<[1], [0], [0], [1], [0, 0, 1, 1], [], []>} : vector<16x25xf32>, vector<25x128xf32>, vector<16x128xf32> -> vector<16x128xf32>
    %c1 = arith.constant 1 : index
    %c0_4 = arith.constant 0 : index
    %c0_5 = arith.constant 0 : index
    %4 = vector.load %arg1[%c1, %c0_4, %c0_5] : memref<4x25x128xf32, #tpu.memory_space<vmem>>, vector<1x25x128xf32>
    %5 = vector.shape_cast %4 : vector<1x25x128xf32> to vector<25x128xf32>
    %cst_6 = arith.constant dense<0.000000e+00> : vector<16x128xf32>
    %6 = tpu.matmul %0, %5, %cst_6 {dimension_numbers = #tpu.dot_dimension_numbers<[1], [0], [0], [1], [0, 0, 1, 1], [], []>} : vector<16x25xf32>, vector<25x128xf32>, vector<16x128xf32> -> vector<16x128xf32>
    %7 = arith.maximumf %3, %6 : vector<16x128xf32>
    %c2 = arith.constant 2 : index
    %c0_7 = arith.constant 0 : index
    %c0_8 = arith.constant 0 : index
    %8 = vector.load %arg1[%c2, %c0_7, %c0_8] : memref<4x25x128xf32, #tpu.memory_space<vmem>>, vector<1x25x128xf32>
    %9 = vector.shape_cast %8 : vector<1x25x128xf32> to vector<25x128xf32>
    %cst_9 = arith.constant dense<0.000000e+00> : vector<16x128xf32>
    %10 = tpu.matmul %0, %9, %cst_9 {dimension_numbers = #tpu.dot_dimension_numbers<[1], [0], [0], [1], [0, 0, 1, 1], [], []>} : vector<16x25xf32>, vector<25x128xf32>, vector<16x128xf32> -> vector<16x128xf32>
    %11 = arith.maximumf %7, %10 : vector<16x128xf32>
    %c3 = arith.constant 3 : index
    %c0_10 = arith.constant 0 : index
    %c0_11 = arith.constant 0 : index
    %12 = vector.load %arg1[%c3, %c0_10, %c0_11] : memref<4x25x128xf32, #tpu.memory_space<vmem>>, vector<1x25x128xf32>
    %13 = vector.shape_cast %12 : vector<1x25x128xf32> to vector<25x128xf32>
    %cst_12 = arith.constant dense<0.000000e+00> : vector<16x128xf32>
    %14 = tpu.matmul %0, %13, %cst_12 {dimension_numbers = #tpu.dot_dimension_numbers<[1], [0], [0], [1], [0, 0, 1, 1], [], []>} : vector<16x25xf32>, vector<25x128xf32>, vector<16x128xf32> -> vector<16x128xf32>
    %15 = arith.maximumf %11, %14 : vector<16x128xf32>
    %c0_13 = arith.constant 0 : index
    %c0_14 = arith.constant 0 : index
    %16 = vector.load %arg3[%c0_13, %c0_14] : memref<16x1xf32, #tpu.memory_space<vmem>>, vector<16x1xf32>
    %17 = vector.broadcast %16 : vector<16x1xf32> to vector<16x128xf32>
    %18 = arith.addf %15, %17 : vector<16x128xf32>
    %cst_15 = arith.constant 0.000000e+00 : f32
    %19 = vector.broadcast %cst_15 : f32 to vector<16x128xf32>
    %20 = arith.maximumf %18, %19 : vector<16x128xf32>
    %c0_16 = arith.constant 0 : index
    %c0_17 = arith.constant 0 : index
    %21 = vector.load %arg4[%c0_16, %c0_17] : memref<16x128xf32, #tpu.memory_space<vmem>>, vector<16x128xf32>
    tpu.vector_store %arg4[%c0_16, %c0_17], %20 {strides = array<i32>} : memref<16x128xf32, #tpu.memory_space<vmem>>, vector<16x128xf32>,
    return
  }
  func.func @transform_0(%arg0: i32) -> (i32, i32, i32) {
    %c0_i32 = arith.constant 0 : i32
    %c0_i32_0 = arith.constant 0 : i32
    %c0_i32_1 = arith.constant 0 : i32
    return %c0_i32, %c0_i32_0, %arg0 : i32, i32, i32
  }
  func.func @transform_1(%arg0: i32) -> (i32, i32) {
    %c0_i32 = arith.constant 0 : i32
    %c0_i32_0 = arith.constant 0 : i32
    %c0_i32_1 = arith.constant 0 : i32
    return %c0_i32, %c0_i32_0 : i32, i32
  }
  func.func @transform_2(%arg0: i32) -> (i32, i32) {
    %c0_i32 = arith.constant 0 : i32
    %c0_i32_0 = arith.constant 0 : i32
    %c0_i32_1 = arith.constant 0 : i32
    return %c0_i32, %c0_i32_0 : i32, i32
  }
  func.func @transform_3(%arg0: i32) -> (i32, i32) {
    %c0_i32 = arith.constant 0 : i32
    %c0_i32_0 = arith.constant 0 : i32
    return %c0_i32, %arg0 : i32, i32
  }
}

module attributes {stable_mosaic.version = 11 : i64} {
  func.func @_conv_relu_pool_kernel(%arg0: i32, %arg1: memref<4x144x128xf32, #tpu.memory_space<vmem>>, %arg2: memref<32x144xf32, #tpu.memory_space<vmem>>, %arg3: memref<32x1xf32, #tpu.memory_space<vmem>>, %arg4: memref<32x128xf32, #tpu.memory_space<vmem>>) attributes {dimension_semantics = [#tpu.dimension_semantics<parallel>], iteration_bounds = array<i64: 1>, scalar_prefetch = 0 : i64, scratch_operands = 0 : i64, tpu.core_type = #tpu.core_type<tc>, window_params = [{transform_indices = @transform_0, window_bounds = array<i64: 4, 144, 128>}, {pipeline_mode = #tpu.pipeline_mode<synchronous>, transform_indices = @transform_1, window_bounds = array<i64: 32, 144>}, {pipeline_mode = #tpu.pipeline_mode<synchronous>, transform_indices = @transform_2, window_bounds = array<i64: 32, 1>}, {transform_indices = @transform_3, window_bounds = array<i64: 32, 128>}]} {
    %c0 = arith.constant 0 : index
    %c0_0 = arith.constant 0 : index
    %0 = vector.load %arg2[%c0, %c0_0] : memref<32x144xf32, #tpu.memory_space<vmem>>, vector<32x144xf32>
    %c0_1 = arith.constant 0 : index
    %c0_2 = arith.constant 0 : index
    %c0_3 = arith.constant 0 : index
    %1 = vector.load %arg1[%c0_1, %c0_2, %c0_3] : memref<4x144x128xf32, #tpu.memory_space<vmem>>, vector<1x144x128xf32>
    %2 = vector.shape_cast %1 : vector<1x144x128xf32> to vector<144x128xf32>
    %cst = arith.constant dense<0.000000e+00> : vector<32x128xf32>
    %3 = tpu.matmul %0, %2, %cst {dimension_numbers = #tpu.dot_dimension_numbers<[1], [0], [0], [1], [0, 0, 1, 1], [], []>} : vector<32x144xf32>, vector<144x128xf32>, vector<32x128xf32> -> vector<32x128xf32>
    %c1 = arith.constant 1 : index
    %c0_4 = arith.constant 0 : index
    %c0_5 = arith.constant 0 : index
    %4 = vector.load %arg1[%c1, %c0_4, %c0_5] : memref<4x144x128xf32, #tpu.memory_space<vmem>>, vector<1x144x128xf32>
    %5 = vector.shape_cast %4 : vector<1x144x128xf32> to vector<144x128xf32>
    %cst_6 = arith.constant dense<0.000000e+00> : vector<32x128xf32>
    %6 = tpu.matmul %0, %5, %cst_6 {dimension_numbers = #tpu.dot_dimension_numbers<[1], [0], [0], [1], [0, 0, 1, 1], [], []>} : vector<32x144xf32>, vector<144x128xf32>, vector<32x128xf32> -> vector<32x128xf32>
    %7 = arith.maximumf %3, %6 : vector<32x128xf32>
    %c2 = arith.constant 2 : index
    %c0_7 = arith.constant 0 : index
    %c0_8 = arith.constant 0 : index
    %8 = vector.load %arg1[%c2, %c0_7, %c0_8] : memref<4x144x128xf32, #tpu.memory_space<vmem>>, vector<1x144x128xf32>
    %9 = vector.shape_cast %8 : vector<1x144x128xf32> to vector<144x128xf32>
    %cst_9 = arith.constant dense<0.000000e+00> : vector<32x128xf32>
    %10 = tpu.matmul %0, %9, %cst_9 {dimension_numbers = #tpu.dot_dimension_numbers<[1], [0], [0], [1], [0, 0, 1, 1], [], []>} : vector<32x144xf32>, vector<144x128xf32>, vector<32x128xf32> -> vector<32x128xf32>
    %11 = arith.maximumf %7, %10 : vector<32x128xf32>
    %c3 = arith.constant 3 : index
    %c0_10 = arith.constant 0 : index
    %c0_11 = arith.constant 0 : index
    %12 = vector.load %arg1[%c3, %c0_10, %c0_11] : memref<4x144x128xf32, #tpu.memory_space<vmem>>, vector<1x144x128xf32>
    %13 = vector.shape_cast %12 : vector<1x144x128xf32> to vector<144x128xf32>
    %cst_12 = arith.constant dense<0.000000e+00> : vector<32x128xf32>
    %14 = tpu.matmul %0, %13, %cst_12 {dimension_numbers = #tpu.dot_dimension_numbers<[1], [0], [0], [1], [0, 0, 1, 1], [], []>} : vector<32x144xf32>, vector<144x128xf32>, vector<32x128xf32> -> vector<32x128xf32>
    %15 = arith.maximumf %11, %14 : vector<32x128xf32>
    %c0_13 = arith.constant 0 : index
    %c0_14 = arith.constant 0 : index
    %16 = vector.load %arg3[%c0_13, %c0_14] : memref<32x1xf32, #tpu.memory_space<vmem>>, vector<32x1xf32>
    %17 = vector.broadcast %16 : vector<32x1xf32> to vector<32x128xf32>
    %18 = arith.addf %15, %17 : vector<32x128xf32>
    %cst_15 = arith.constant 0.000000e+00 : f32
    %19 = vector.broadcast %cst_15 : f32 to vector<32x128xf32>
    %20 = arith.maximumf %18, %19 : vector<32x128xf32>
    %c0_16 = arith.constant 0 : index
    %c0_17 = arith.constant 0 : index
    %21 = vector.load %arg4[%c0_16, %c0_17] : memref<32x128xf32, #tpu.memory_space<vmem>>, vector<32x128xf32>
    tpu.vector_store %arg4[%c0_16, %c0_17], %20 {strides = array<i32>} : memref<32x128xf32, #tpu.memory_space<vmem>>, vector<32x128xf32>,
    return
  }
  func.func @transform_0(%arg0: i32) -> (i32, i32, i32) {
    %c0_i32 = arith.constant 0 : i32
    %c0_i32_0 = arith.constant 0 : i32
    %c0_i32_1 = arith.constant 0 : i32
    return %c0_i32, %c0_i32_0, %arg0 : i32, i32, i32
  }
  func.func @transform_1(%arg0: i32) -> (i32, i32) {
    %c0_i32 = arith.constant 0 : i32
    %c0_i32_0 = arith.constant 0 : i32
    %c0_i32_1 = arith.constant 0 : i32
    return %c0_i32, %c0_i32_0 : i32, i32
  }
  func.func @transform_2(%arg0: i32) -> (i32, i32) {
    %c0_i32 = arith.constant 0 : i32
    %c0_i32_0 = arith.constant 0 : i32
    %c0_i32_1 = arith.constant 0 : i32
    return %c0_i32, %c0_i32_0 : i32, i32
  }
  func.func @transform_3(%arg0: i32) -> (i32, i32) {
    %c0_i32 = arith.constant 0 : i32
    %c0_i32_0 = arith.constant 0 : i32
    return %c0_i32, %arg0 : i32, i32
  }
}

module attributes {stable_mosaic.version = 11 : i64} {
  func.func @_fc3_kernel(%arg0: i32, %arg1: memref<800x128xf32, #tpu.memory_space<vmem>>, %arg2: memref<120x800xf32, #tpu.memory_space<vmem>>, %arg3: memref<120x1xf32, #tpu.memory_space<vmem>>, %arg4: memref<84x120xf32, #tpu.memory_space<vmem>>, %arg5: memref<84x1xf32, #tpu.memory_space<vmem>>, %arg6: memref<10x84xf32, #tpu.memory_space<vmem>>, %arg7: memref<10x1xf32, #tpu.memory_space<vmem>>, %arg8: memref<10x128xf32, #tpu.memory_space<vmem>>) attributes {dimension_semantics = [#tpu.dimension_semantics<parallel>], iteration_bounds = array<i64: 1>, scalar_prefetch = 0 : i64, scratch_operands = 0 : i64, tpu.core_type = #tpu.core_type<tc>, window_params = [{transform_indices = @transform_0, window_bounds = array<i64: 800, 128>}, {pipeline_mode = #tpu.pipeline_mode<synchronous>, transform_indices = @transform_1, window_bounds = array<i64: 120, 800>}, {pipeline_mode = #tpu.pipeline_mode<synchronous>, transform_indices = @transform_2, window_bounds = array<i64: 120, 1>}, {pipeline_mode = #tpu.pipeline_mode<synchronous>, transform_indices = @transform_3, window_bounds = array<i64: 84, 120>}, {pipeline_mode = #tpu.pipeline_mode<synchronous>, transform_indices = @transform_4, window_bounds = array<i64: 84, 1>}, {pipeline_mode = #tpu.pipeline_mode<synchronous>, transform_indices = @transform_5, window_bounds = array<i64: 10, 84>}, {pipeline_mode = #tpu.pipeline_mode<synchronous>, transform_indices = @transform_6, window_bounds = array<i64: 10, 1>}, {transform_indices = @transform_7, window_bounds = array<i64: 10, 128>}]} {
    %c0 = arith.constant 0 : index
    %c0_0 = arith.constant 0 : index
    %0 = vector.load %arg2[%c0, %c0_0] : memref<120x800xf32, #tpu.memory_space<vmem>>, vector<120x800xf32>
    %c0_1 = arith.constant 0 : index
    %c0_2 = arith.constant 0 : index
    %1 = vector.load %arg1[%c0_1, %c0_2] : memref<800x128xf32, #tpu.memory_space<vmem>>, vector<800x128xf32>
    %cst = arith.constant dense<0.000000e+00> : vector<120x128xf32>
    %2 = tpu.matmul %0, %1, %cst {dimension_numbers = #tpu.dot_dimension_numbers<[1], [0], [0], [1], [0, 0, 1, 1], [], []>} : vector<120x800xf32>, vector<800x128xf32>, vector<120x128xf32> -> vector<120x128xf32>
    %c0_3 = arith.constant 0 : index
    %c0_4 = arith.constant 0 : index
    %3 = vector.load %arg3[%c0_3, %c0_4] : memref<120x1xf32, #tpu.memory_space<vmem>>, vector<120x1xf32>
    %4 = vector.broadcast %3 : vector<120x1xf32> to vector<120x128xf32>
    %5 = arith.addf %2, %4 : vector<120x128xf32>
    %cst_5 = arith.constant 0.000000e+00 : f32
    %6 = vector.broadcast %cst_5 : f32 to vector<120x128xf32>
    %7 = arith.maximumf %5, %6 : vector<120x128xf32>
    %c0_6 = arith.constant 0 : index
    %c0_7 = arith.constant 0 : index
    %8 = vector.load %arg4[%c0_6, %c0_7] : memref<84x120xf32, #tpu.memory_space<vmem>>, vector<84x120xf32>
    %cst_8 = arith.constant dense<0.000000e+00> : vector<84x128xf32>
    %9 = tpu.matmul %8, %7, %cst_8 {dimension_numbers = #tpu.dot_dimension_numbers<[1], [0], [0], [1], [0, 0, 1, 1], [], []>} : vector<84x120xf32>, vector<120x128xf32>, vector<84x128xf32> -> vector<84x128xf32>
    %c0_9 = arith.constant 0 : index
    %c0_10 = arith.constant 0 : index
    %10 = vector.load %arg5[%c0_9, %c0_10] : memref<84x1xf32, #tpu.memory_space<vmem>>, vector<84x1xf32>
    %11 = vector.broadcast %10 : vector<84x1xf32> to vector<84x128xf32>
    %12 = arith.addf %9, %11 : vector<84x128xf32>
    %cst_11 = arith.constant 0.000000e+00 : f32
    %13 = vector.broadcast %cst_11 : f32 to vector<84x128xf32>
    %14 = arith.maximumf %12, %13 : vector<84x128xf32>
    %c0_12 = arith.constant 0 : index
    %c0_13 = arith.constant 0 : index
    %15 = vector.load %arg6[%c0_12, %c0_13] : memref<10x84xf32, #tpu.memory_space<vmem>>, vector<10x84xf32>
    %cst_14 = arith.constant dense<0.000000e+00> : vector<10x128xf32>
    %16 = tpu.matmul %15, %14, %cst_14 {dimension_numbers = #tpu.dot_dimension_numbers<[1], [0], [0], [1], [0, 0, 1, 1], [], []>} : vector<10x84xf32>, vector<84x128xf32>, vector<10x128xf32> -> vector<10x128xf32>
    %c0_15 = arith.constant 0 : index
    %c0_16 = arith.constant 0 : index
    %17 = vector.load %arg7[%c0_15, %c0_16] : memref<10x1xf32, #tpu.memory_space<vmem>>, vector<10x1xf32>
    %18 = vector.broadcast %17 : vector<10x1xf32> to vector<10x128xf32>
    %19 = arith.addf %16, %18 : vector<10x128xf32>
    %c0_17 = arith.constant 0 : index
    %c0_18 = arith.constant 0 : index
    %20 = vector.load %arg8[%c0_17, %c0_18] : memref<10x128xf32, #tpu.memory_space<vmem>>, vector<10x128xf32>
    tpu.vector_store %arg8[%c0_17, %c0_18], %19 {strides = array<i32>} : memref<10x128xf32, #tpu.memory_space<vmem>>, vector<10x128xf32>,
    return
  }
  func.func @transform_0(%arg0: i32) -> (i32, i32) {
    %c0_i32 = arith.constant 0 : i32
    %c0_i32_0 = arith.constant 0 : i32
    return %c0_i32, %arg0 : i32, i32
  }
  func.func @transform_1(%arg0: i32) -> (i32, i32) {
    %c0_i32 = arith.constant 0 : i32
    %c0_i32_0 = arith.constant 0 : i32
    %c0_i32_1 = arith.constant 0 : i32
    return %c0_i32, %c0_i32_0 : i32, i32
  }
  func.func @transform_2(%arg0: i32) -> (i32, i32) {
    %c0_i32 = arith.constant 0 : i32
    %c0_i32_0 = arith.constant 0 : i32
    %c0_i32_1 = arith.constant 0 : i32
    return %c0_i32, %c0_i32_0 : i32, i32
  }
  func.func @transform_3(%arg0: i32) -> (i32, i32) {
    %c0_i32 = arith.constant 0 : i32
    %c0_i32_0 = arith.constant 0 : i32
    %c0_i32_1 = arith.constant 0 : i32
    return %c0_i32, %c0_i32_0 : i32, i32
  }
  func.func @transform_4(%arg0: i32) -> (i32, i32) {
    %c0_i32 = arith.constant 0 : i32
    %c0_i32_0 = arith.constant 0 : i32
    %c0_i32_1 = arith.constant 0 : i32
    return %c0_i32, %c0_i32_0 : i32, i32
  }
  func.func @transform_5(%arg0: i32) -> (i32, i32) {
    %c0_i32 = arith.constant 0 : i32
    %c0_i32_0 = arith.constant 0 : i32
    %c0_i32_1 = arith.constant 0 : i32
    return %c0_i32, %c0_i32_0 : i32, i32
  }
  func.func @transform_6(%arg0: i32) -> (i32, i32) {
    %c0_i32 = arith.constant 0 : i32
    %c0_i32_0 = arith.constant 0 : i32
    %c0_i32_1 = arith.constant 0 : i32
    return %c0_i32, %c0_i32_0 : i32, i32
  }
  func.func @transform_7(%arg0: i32) -> (i32, i32) {
    %c0_i32 = arith.constant 0 : i32
    %c0_i32_0 = arith.constant 0 : i32
    return %c0_i32, %arg0 : i32, i32
  }
}

</mosaic_0001>

<bundles_post_ra>
// kernel: convnet_forward.3
= control target key start
LH: loop header
LB: loop body
LE: loop exit
PB: predicated region body
PF: predicated region fallthrough
CT: control target
= control target key end

     0   :  { %s943_s12 = smov 0   ;;  %s945_s13 = smov 0   ;;  %s1083_s0 = inlined_call_operand.vmem [shape: f32[4,25,384], index: 0, kind: input, shape index: {}]   ;;  %s1084_s1 = inlined_call_operand.vmem [shape: f32[16,25], index: 1, kind: input, shape index: {}]   ;;  %s1085_s2 = inlined_call_operand.vmem [shape: f32[16,1], index: 2, kind: input, shape index: {}]   ;;  %s1086_s3 = inlined_call_operand.vmem [shape: f32[16,384], index: 3, kind: output, shape index: {}]  }
   0x1   :  { %s947_s14 = smov 0  }
   0x2 LB: > { %s725_s15 = sadd.s32 4294967295, %s919_s14   ;;  %s960_s16 = sadd.s32 1, %s919_s14   ;;  %s919_s14 = sphi %s947_s14, %s1092_s14   ;;  %s915_s13 = sphi %s945_s13, %s1091_s13   ;;  %s911_s12 = sphi %s943_s12, %s1090_s12  }
   0x3   : > { %s17_s17 = ssub.s32 %s919_s14, %s960_s16  ;;  %s20_s18 = sadd.s32 1, %s915_s13 }
   0x4   : > { %p18_p0 = scmp.eq.s32.totalorder %s17_s17, 0  ;;  %p27_p1 = scmp.ne.s32.totalorder %s915_s13, %s911_s12 }
   0x5   : > { %p28_p2 = scmp.eq.s32.totalorder %s919_s14, 0  ;;  %p99_p3 = scmp.eq.s32.totalorder %s725_s15, 2 }
   0x6   : > { %s971_s19 = scalar_select %p18_p0, %s915_s13, %s20_s18  }
   0x7   : > { %p29_p4 = por %p28_p2, %p27_p1  ;;  %p973_p5 = por %p99_p3, %p27_p1 }
   0x8   : > { %p728_p6 = scmp.ge.s32.totalorder %s919_s14, 3 }
   0xa   : > { %127 = sbr.rel (%p728_p6) target bundleno = 29 (0x1d), region = 24 }
  0x11   : > { %130 = sbr.rel (!%p29_p4) target bundleno = 29 (0x1d), region = 28  ;;  %s132_s21 = sand.u32 (%p29_p4), 1, %s915_s13  }
  0x12   : > { %s730_s22 = sshll.u32 (%p29_p4), %s919_s14, 3  ;;  %s729_s23 = sshll.u32 (%p29_p4), %s132_s21, 7 }
  0x13   : > { %s983_s26 = scalar_lea.vmem (%p29_p4), %s1083_s0, %s730_s22  ;;  %s134_s27 = scalar_lea.vmem (%p29_p4), [#allocation2], %s729_s23 }
  0x14   : > { %v194_v0 = vld [vmem:[%s983_s26] sm:$0xff] (%p29_p4)  ;;  %v196_v1 = vld [vmem:[%s983_s26 + $0x18] sm:$0xff] (%p29_p4)  ;;  %v198_v2 = vld [vmem:[%s983_s26 + $0x30] sm:$0xff] (%p29_p4) }
  0x15   : > { %195 = vst [vmem:[%s134_s27] sm:$0xff] (%p29_p4), %v194_v0  ;;  %197 = vst [vmem:[%s134_s27 + $0x8] sm:$0xff] (%p29_p4), %v196_v1  ;;  %v200_v3 = vld [vmem:[%s983_s26 + $0x48] sm:$0xff] (%p29_p4)  ;;  %v202_v4 = vld [vmem:[%s983_s26 + $0x60] sm:$0xff] (%p29_p4) }
  0x16   : > { %199 = vst [vmem:[%s134_s27 + $0x10] sm:$0xff] (%p29_p4), %v198_v2  ;;  %v204_v5 = vld [vmem:[%s983_s26 + $0x78] sm:$0xff] (%p29_p4)  ;;  %201 = vst [vmem:[%s134_s27 + $0x18] sm:$0xff] (%p29_p4), %v200_v3  ;;  %v206_v6 = vld [vmem:[%s983_s26 + $0x90] sm:$0xff] (%p29_p4) }
  0x17   : > { %203 = vst [vmem:[%s134_s27 + $0x20] sm:$0xff] (%p29_p4), %v202_v4  ;;  %205 = vst [vmem:[%s134_s27 + $0x28] sm:$0xff] (%p29_p4), %v204_v5  ;;  %v208_v7 = vld [vmem:[%s983_s26 + $0xa8] sm:$0xff] (%p29_p4)  ;;  %v210_v8 = vld [vmem:[%s983_s26 + $0xc0] sm:$0xff] (%p29_p4) }
  0x18   : > { %207 = vst [vmem:[%s134_s27 + $0x30] sm:$0xff] %v206_v6  ;;  %209 = vst [vmem:[%s134_s27 + $0x38] sm:$0xff] %v208_v7  ;;  %v212_v9 = vld [vmem:[%s983_s26 + $0xd8] sm:$0xff]  ;;  %v214_v10 = vld [vmem:[%s983_s26 + $0xf0] sm:$0xff] }
  0x19   : > { %211 = vst [vmem:[%s134_s27 + $0x40] sm:$0xff] %v210_v8  ;;  %v216_v11 = vld [vmem:[%s983_s26 + $0x108] sm:$0xff]  ;;  %213 = vst [vmem:[%s134_s27 + $0x48] sm:$0xff] %v212_v9  ;;  %v218_v12 = vld [vmem:[%s983_s26 + $0x120] sm:$0xff] }
  0x1a   : > { %215 = vst [vmem:[%s134_s27 + $0x50] sm:$0xff] %v214_v10  ;;  %217 = vst [vmem:[%s134_s27 + $0x58] sm:$0xff] %v216_v11  ;;  %v220_v13 = vld [vmem:[%s983_s26 + $0x138] sm:$0xff]  ;;  %v222_v14 = vld [vmem:[%s983_s26 + $0x150] sm:$0xff] }
  0x1b   : > { %219 = vst [vmem:[%s134_s27 + $0x60] sm:$0xff] %v218_v12  ;;  %221 = vst [vmem:[%s134_s27 + $0x68] sm:$0xff] %v220_v13  ;;  %v224_v15 = vld [vmem:[%s983_s26 + $0x168] sm:$0xff] }
  0x1c   : > { %223 = vst [vmem:[%s134_s27 + $0x70] sm:$0xff] %v222_v14  ;;  %225 = vst [vmem:[%s134_s27 + $0x78] sm:$0xff] %v224_v15 }
  0x1d PF: > { %p731_p7 = scmp.ge.s32.totalorder %s919_s14, 1  ;;  %p230_p8 = scmp.lt.s32.totalorder %s919_s14, 4 }
  0x1f   : > { %p231_p9 = pnand %p731_p7, %p230_p8 }
  0x20   : > { %s237_s28 = sand.u32 (!%p231_p9), 1, %s911_s12   ;;  %vm272_vm0 = vcmask (!%p231_p9), 1040384   ;;  %v259_v16 = vld [vmem:[%s1084_s1] sm:$0xff] (!%p231_p9)  ;;  %vm265_vm1 = vcmask (!%p231_p9), 203776   ;;  %vm921_vm2 = vmmov (!%p231_p9), 1   ;;  %v922_v19 = vmov (!%p231_p9), 0  }
  0x21   : > { %234 = sbr.rel (%p231_p9) target bundleno = 284 (0x11c), region = 66  ;;  %s732_s4 = sshll.u32 (!%p231_p9), %s237_s28, 7  ;;  %794 = vmatprep.mubr.msk.f32.mxu0 (!%p231_p9), %vm265_vm1, %v259_v16  ;;  %805 = vmatprep.mubr.msk.f32.mxu1 (!%p231_p9), %vm265_vm1, %v259_v16  ;;  %v606_v17 = vld [vmem:[%s1085_s2] sm:$0xff] (!%p231_p9)  ;;  %vm1014_vm3 = vmpackc.low (!%p231_p9), %vm272_vm0, %vm921_vm2  ;;  %v607_v27 = vld [vmem:[%s1085_s2 + $0x8] sm:$0xff] (!%p231_p9) }
  0x22   : > { %896 = vset.pattern.permute.xlu0 (!%p231_p9), %v922_v19  ;;  %s1018_s7 = scalar_lea.vmem (!%p231_p9), [#allocation2], %s732_s4  ;;  %v260_v43 = vld [vmem:[%s1084_s1 + $0x8] sm:$0xff] (!%p231_p9)  ;;  %s733_s17 = sshll.u32 (!%p231_p9), %s237_s28, 4 }
  0x23   : > { %v261_v20 = vld [vmem:[%s1018_s7] sm:$0xff] (!%p231_p9)  ;;  %v262_v21 = vld [vmem:[%s1018_s7 + $0x8] sm:$0xff] (!%p231_p9)  ;;  %610 = vperm.xlu0 (!%p231_p9), %896, %v606_v17   ;;  %v263_v25 = vld [vmem:[%s1018_s7 + $0x10] sm:$0xff] (!%p231_p9)  ;;  %s258_s18 = scalar_lea.vmem (!%p231_p9), [#allocation3], %s733_s17 }
  0x24   : > { %v737_v22 = vld [vmem:[%s1018_s7 + $0x20] sm:$0xff] (!%p231_p9)  ;;  %v830_v23 = vpack.c.bf16 (!%p231_p9), %v262_v21, %v261_v20  ;;  %v738_v24 = vld [vmem:[%s1018_s7 + $0x28] sm:$0xff] (!%p231_p9)  ;;  %v264_v26 = vld [vmem:[%s1018_s7 + $0x18] sm:$0x1] (!%p231_p9) }
  0x25   : > { %v840_v28 = vpack.c.bf16 (!%p231_p9), %v738_v24, %v737_v22  ;;  %v834_v29 = vpack.c.bf16 (!%p231_p9), %v264_v26, %v263_v25  ;;  %v739_v30 = vld [vmem:[%s1018_s7 + $0x30] sm:$0xff] (!%p231_p9)  ;;  %v740_v31 = vld [vmem:[%s1018_s7 + $0x38] sm:$0x1] (!%p231_p9)  ;;  %v744_v32 = vld [vmem:[%s1018_s7 + $0x40] sm:$0xff] (!%p231_p9) }
  0x26   : > { %831 = vmatprep.subr.bf16.mxu0 (!%p231_p9), %v830_v23  ;;  %v844_v33 = vpack.c.bf16 (!%p231_p9), %v740_v31, %v739_v30  ;;  %v745_v34 = vld [vmem:[%s1018_s7 + $0x48] sm:$0xff] (!%p231_p9)  ;;  %v751_v35 = vld [vmem:[%s1018_s7 + $0x60] sm:$0xff] (!%p231_p9)  ;;  %v746_v39 = vld [vmem:[%s1018_s7 + $0x50] sm:$0xff] (!%p231_p9) }
  0x27   : > { %v752_v36 = vld [vmem:[%s1018_s7 + $0x68] sm:$0xff] (!%p231_p9)  ;;  %841 = vmatprep.subr.bf16.mxu1 (!%p231_p9), %v840_v28  ;;  %833 = vmatpush3.bf16.msra.mxu0 (!%p231_p9), %v830_v23  ;;  %v850_v37 = vpack.c.bf16 (!%p231_p9), %v745_v34, %v744_v32  ;;  %v747_v40 = vld [vmem:[%s1018_s7 + $0x58] sm:$0x1] (!%p231_p9)  ;;  %v753_v41 = vld [vmem:[%s1018_s7 + $0x70] sm:$0xff] (!%p231_p9) }
  0x28   : > { %843 = vmatpush3.bf16.msra.mxu1 %v840_v28  ;;  %836 = vmatprep.subr.msk.bf16.mxu0 %vm1014_vm3, %v834_v29  ;;  %v860_v38 = vpack.c.bf16 %v752_v36, %v751_v35  ;;  %v754_v42 = vld [vmem:[%s1018_s7 + $0x78] sm:$0x1]  ;;  %v854_v44 = vpack.c.bf16 %v747_v40, %v746_v39  ;;  %s759_s21 = sshll.u32 (%p973_p5), %s725_s15, 3 }
  0x29   : > { %846 = vmatprep.subr.msk.bf16.mxu1 %vm1014_vm3, %v844_v33  ;;  %615 = vperm.xlu0 %896, %v607_v27   ;;  %v864_v45 = vpack.c.bf16 %v754_v42, %v753_v41  ;;  %s632_s23 = scalar_lea.vmem (%p973_p5), %s1086_s3, %s759_s21 }
  0x2b   : > { %839 = vmatpush3.bf16.msk.msra.mxu0 %vm1014_vm3, %v834_v29 }
  0x2c   : > { %849 = vmatpush3.bf16.msk.msra.mxu1 %vm1014_vm3, %v844_v33  ;;  %851 = vmatprep.subr.bf16.mxu0 %v850_v37 }
  0x2d   : > { %861 = vmatprep.subr.bf16.mxu1 %v860_v38 }
  0x2e   : > { %795 = vmatmul.mubr.msk.f32.vlgmr.msra.gmra.mrb[0].mxu0 %vm265_vm1, %v260_v43 }
  0x2f   : > { %806 = vmatmul.mubr.msk.f32.vlgmr.msra.gmra.mrb[0].mxu1 %vm265_vm1, %v260_v43  ;;  %853 = vmatpush3.bf16.msra.mxu0 %v850_v37 }
  0x30   : > { %863 = vmatpush3.bf16.msra.mxu1 %v860_v38  ;;  %856 = vmatprep.subr.msk.bf16.mxu0 %vm1014_vm3, %v854_v44 }
  0x31   : > { %866 = vmatprep.subr.msk.bf16.mxu1 %vm1014_vm3, %v864_v45  ;;  %816 = vmatprep.mubr.msk.f32.mxu0 %vm265_vm1, %v259_v16 }
  0x32   : > { %827 = vmatprep.mubr.msk.f32.mxu1 %vm265_vm1, %v259_v16 }
  0x33   : > { %859 = vmatpush3.bf16.msk.msra.mxu0 %vm1014_vm3, %v854_v44 }
  0x34   : > { %869 = vmatpush3.bf16.msk.msra.mxu1 %vm1014_vm3, %v864_v45 }
  0x36   : > { %817 = vmatmul.mubr.msk.f32.vlgmr.msra.gmra.mrb[2].mxu0 %vm265_vm1, %v260_v43 }
  0x37   : > { %828 = vmatmul.mubr.msk.f32.vlgmr.msra.gmra.mrb[2].mxu1 %vm265_vm1, %v260_v43 }
  0xa2   : > { %v611_v52 = vpop.permute.xlu0 %610 }
  0xa8   : > { %v616_v60 = vpop.permute.xlu0 %615 }
 0x101   : > { %v796_v46 = vpop.f32.mrb[0].mxu0 }
 0x102   : > { %v807_v47 = vpop.f32.mrb[0].mxu1  ;;  %v342_v48 = vpop.f32.mrb[1].mxu0 }
 0x103   : > { %v435_v49 = vmax.f32 %v796_v46, %v807_v47  ;;  %v425_v50 = vpop.f32.mrb[1].mxu1 }
 0x104   : > { %v434_v51 = vmax.f32 %v342_v48, %v425_v50 }
 0x109   : > { %v818_v53 = vpop.f32.mrb[2].mxu0 }
 0x10a   : > { %v520_v54 = vmax.f32 %v435_v49, %v818_v53  ;;  %v510_v55 = vpop.f32.mrb[3].mxu0  ;;  %v829_v56 = vpop.f32.mrb[2].mxu1 }
 0x10b   : > { %v519_v57 = vmax.f32 %v434_v51, %v510_v55  ;;  %v595_v58 = vpop.f32.mrb[3].mxu1 }
 0x10c   : > { %v605_v59 = vmax.f32 %v520_v54, %v829_v56 }
 0x10d   : > { %v604_v61 = vmax.f32 %v519_v57, %v595_v58  ;;  %630 = sbr.rel (!%p973_p5) target bundleno = 284 (0x11c), region = 74 }
 0x10e   : > { %v619_v62 = vadd.f32 %v616_v60, %v605_v59 }
 0x10f   : > { %v618_v63 = vadd.f32 %v611_v52, %v604_v61 }
 0x110   : > { %v621_v0 = vmax.f32 %v619_v62, 0.0 }
 0x111   : > { %v620_v1 = vmax.f32 %v618_v63, 0.0 }
 0x112   : > { %623 = vst [vmem:[%s258_s18 + $0x8] sm:$0xff] %v621_v0 }
 0x113   : > { %622 = vst [vmem:[%s258_s18] sm:$0xff] %v620_v1 }
 0x119   : > { %v664_v3 = vld [vmem:[%s258_s18 + $0x8] sm:$0xff] }
 0x11a   : > { %v662_v2 = vld [vmem:[%s258_s18] sm:$0xff]  ;;  %665 = vst [vmem:[%s632_s23 + $0x18] sm:$0xff] %v664_v3 }
 0x11b   : > { %663 = vst [vmem:[%s632_s23] sm:$0xff] %v662_v2 }
 0x11c PF: > { %p10_p10 = scmp.ge.s32.totalorder %s960_s16, 5   ;;  %s1090_s12 = smov %s915_s13 }
 0x11d   : > { %s1091_s13 = smov %s971_s19  ;;  %s1092_s14 = smov %s960_s16 }
 0x11e   :  { %12 = sbr.rel (!%p10_p10) target bundleno = 2 (0x2), region = 146 }

// kernel: convnet_forward.4
= control target key start
LH: loop header
LB: loop body
LE: loop exit
PB: predicated region body
PF: predicated region fallthrough
CT: control target
= control target key end

     0   :  { %v684_v0 = vmov 0.0|0.0   ;;  %v685_v8 = vmov 0   ;;  %vm40_vm0 = vcmask 130048   ;;  %s1070_s0 = inlined_call_operand.vmem [shape: f32[4,144,128], index: 0, kind: input, shape index: {}]   ;;  %s1071_s1 = inlined_call_operand.vmem [shape: f32[32,144], index: 1, kind: input, shape index: {}]   ;;  %s1072_s2 = inlined_call_operand.vmem [shape: f32[32,1], index: 2, kind: input, shape index: {}]   ;;  %s1073_s3 = inlined_call_operand.vmem [shape: f32[32,128], index: 3, kind: output, shape index: {}]  }
   0x1   :  { %572 = vmatprep.subr.bf16.mxu0 %v684_v0  ;;  %v22_v1 = vld [vmem:[%s1070_s0] sm:$0xff]  ;;  %v23_v2 = vld [vmem:[%s1070_s0 + $0x8] sm:$0xff]  ;;  %599 = vmatprep.subr.bf16.mxu1 %v684_v0  ;;  %v506_v3 = vld [vmem:[%s1070_s0 + $0x90] sm:$0xff] }
   0x2   :  { %v573_v4 = vpack.c.bf16 %v23_v2, %v22_v1  ;;  %v507_v5 = vld [vmem:[%s1070_s0 + $0x98] sm:$0xff]  ;;  %v24_v6 = vld [vmem:[%s1070_s0 + $0x10] sm:$0xff]  ;;  %682 = vset.pattern.permute.xlu0 %v685_v8  ;;  %683 = vset.pattern.permute.xlu1 %v685_v8  ;;  %v508_v10 = vld [vmem:[%s1070_s0 + $0xa0] sm:$0xff] }
   0x3   :  { %v25_v7 = vld [vmem:[%s1070_s0 + $0x18] sm:$0xff]  ;;  %v600_v9 = vpack.c.bf16 %v507_v5, %v506_v3  ;;  %v509_v11 = vld [vmem:[%s1070_s0 + $0xa8] sm:$0xff]  ;;  %v26_v14 = vld [vmem:[%s1070_s0 + $0x20] sm:$0xff] }
   0x4   :  { %574 = vmatpush1.bf16.msra.mxu0 %v573_v4  ;;  %v576_v12 = vpack.c.bf16 %v25_v7, %v24_v6  ;;  %v603_v13 = vpack.c.bf16 %v509_v11, %v508_v10  ;;  %v27_v15 = vld [vmem:[%s1070_s0 + $0x28] sm:$0xff]  ;;  %v510_v16 = vld [vmem:[%s1070_s0 + $0xb0] sm:$0xff]  ;;  %v511_v17 = vld [vmem:[%s1070_s0 + $0xb8] sm:$0xff] }
   0x5   :  { %601 = vmatpush1.bf16.msra.mxu1 %v600_v9  ;;  %575 = vmatprep.subr.bf16.mxu0 %v684_v0  ;;  %v579_v18 = vpack.c.bf16 %v27_v15, %v26_v14  ;;  %v606_v19 = vpack.c.bf16 %v511_v17, %v510_v16  ;;  %v28_v20 = vld [vmem:[%s1070_s0 + $0x30] sm:$0xff]  ;;  %v29_v21 = vld [vmem:[%s1070_s0 + $0x38] sm:$0xff]  ;;  %v512_v22 = vld [vmem:[%s1070_s0 + $0xc0] sm:$0xff] }
   0x6   :  { %602 = vmatprep.subr.bf16.mxu1 %v684_v0  ;;  %v513_v23 = vld [vmem:[%s1070_s0 + $0xc8] sm:$0xff]  ;;  %v582_v24 = vpack.c.bf16 %v29_v21, %v28_v20  ;;  %v30_v26 = vld [vmem:[%s1070_s0 + $0x40] sm:$0xff]  ;;  %v514_v29 = vld [vmem:[%s1070_s0 + $0xd0] sm:$0xff] }
   0x7   :  { %v609_v25 = vpack.c.bf16 %v513_v23, %v512_v22  ;;  %v31_v27 = vld [vmem:[%s1070_s0 + $0x48] sm:$0xff]  ;;  %v515_v30 = vld [vmem:[%s1070_s0 + $0xd8] sm:$0xff]  ;;  %v32_v33 = vld [vmem:[%s1070_s0 + $0x50] sm:$0xff] }
   0x8   :  { %577 = vmatpush1.bf16.msra.mxu0 %v576_v12  ;;  %v770_v28 = vld [vmem:[%s1071_s1 + $0x8] sm:$0xff]  ;;  %v585_v31 = vpack.c.bf16 %v31_v27, %v30_v26  ;;  %v612_v32 = vpack.c.bf16 %v515_v30, %v514_v29  ;;  %v33_v34 = vld [vmem:[%s1070_s0 + $0x58] sm:$0xff]  ;;  %v516_v35 = vld [vmem:[%s1070_s0 + $0xe0] sm:$0xff] }
   0x9   :  { %604 = vmatpush1.bf16.msra.mxu1 %v603_v13  ;;  %578 = vmatprep.subr.bf16.mxu0 %v684_v0  ;;  %v517_v36 = vld [vmem:[%s1070_s0 + $0xe8] sm:$0xff]  ;;  %v588_v37 = vpack.c.bf16 %v33_v34, %v32_v33  ;;  %v34_v39 = vld [vmem:[%s1070_s0 + $0x60] sm:$0xff]  ;;  %v518_v41 = vld [vmem:[%s1070_s0 + $0xf0] sm:$0xff] }
   0xa   :  { %605 = vmatprep.subr.bf16.mxu1 %v684_v0  ;;  %502 = vmatprep.mubr.msk.f32.mxu0 %vm40_vm0, %v770_v28  ;;  %v615_v38 = vpack.c.bf16 %v517_v36, %v516_v35  ;;  %v35_v40 = vld [vmem:[%s1070_s0 + $0x68] sm:$0xff]  ;;  %v519_v42 = vld [vmem:[%s1070_s0 + $0xf8] sm:$0xff]  ;;  %v36_v45 = vld [vmem:[%s1070_s0 + $0x70] sm:$0xff] }
   0xb   :  { %524 = vmatprep.mubr.msk.f32.mxu1 %vm40_vm0, %v770_v28  ;;  %v591_v43 = vpack.c.bf16 %v35_v40, %v34_v39  ;;  %v618_v44 = vpack.c.bf16 %v519_v42, %v518_v41  ;;  %v37_v46 = vld [vmem:[%s1070_s0 + $0x78] sm:$0xff]  ;;  %v520_v47 = vld [vmem:[%s1070_s0 + $0x100] sm:$0xff]  ;;  %v521_v48 = vld [vmem:[%s1070_s0 + $0x108] sm:$0xff] }
   0xc   :  { %580 = vmatpush1.bf16.msra.mxu0 %v579_v18  ;;  %v462_v49 = vld [vmem:[%s1072_s2] sm:$0xff]  ;;  %v594_v50 = vpack.c.bf16 %v37_v46, %v36_v45  ;;  %v464_v51 = vld [vmem:[%s1072_s2 + $0x10] sm:$0xff]  ;;  %v621_v52 = vpack.c.bf16 %v521_v48, %v520_v47  ;;  %v39_v54 = vld [vmem:[%s1070_s0 + $0x88] sm:$0xff] }
   0xd   :  { %607 = vmatpush1.bf16.msra.mxu1 %v606_v19  ;;  %581 = vmatprep.subr.bf16.mxu0 %v684_v0  ;;  %v38_v53 = vld [vmem:[%s1070_s0 + $0x80] sm:$0xff]  ;;  %v463_v55 = vld [vmem:[%s1072_s2 + $0x8] sm:$0xff]  ;;  %v522_v56 = vld [vmem:[%s1070_s0 + $0x110] sm:$0xff] }
   0xe   :  { %608 = vmatprep.subr.bf16.mxu1 %v684_v0  ;;  %468 = vperm.xlu0 %682, %v462_v49   ;;  %v523_v57 = vld [vmem:[%s1070_s0 + $0x118] sm:$0xff]  ;;  %v597_v59 = vpack.c.bf16 %v39_v54, %v38_v53  ;;  %v528_v61 = vld [vmem:[%s1070_s0 + $0x120] sm:$0xff]  ;;  %v529_v62 = vld [vmem:[%s1070_s0 + $0x128] sm:$0xff] }
   0xf   :  { %478 = vperm.xlu1 %683, %v464_v51   ;;  %v465_v58 = vld [vmem:[%s1072_s2 + $0x18] sm:$0xff]  ;;  %v624_v60 = vpack.c.bf16 %v523_v57, %v522_v56  ;;  %v550_v63 = vld [vmem:[%s1070_s0 + $0x1b0] sm:$0xff]  ;;  %v868_v2 = vld [vmem:[%s1071_s1] sm:$0xff]  ;;  %v627_v3 = vpack.c.bf16 %v529_v62, %v528_v61 }
  0x10   :  { %583 = vmatpush1.bf16.msra.mxu0 %v582_v24  ;;  %v551_v1 = vld [vmem:[%s1070_s0 + $0x1b8] sm:$0xff]  ;;  %v530_v5 = vld [vmem:[%s1070_s0 + $0x130] sm:$0xff]  ;;  %v552_v7 = vld [vmem:[%s1070_s0 + $0x1c0] sm:$0xff] }
  0x11   :  { %610 = vmatpush1.bf16.msra.mxu1 %v609_v25  ;;  %584 = vmatprep.subr.bf16.mxu0 %v684_v0  ;;  %v654_v4 = vpack.c.bf16 %v551_v1, %v550_v63  ;;  %v531_v6 = vld [vmem:[%s1070_s0 + $0x138] sm:$0xff]  ;;  %v553_v8 = vld [vmem:[%s1070_s0 + $0x1c8] sm:$0xff]  ;;  %v894_v11 = vld [vmem:[%s1071_s1 + $0x10] sm:$0xff] }
  0x12   :  { %611 = vmatprep.subr.bf16.mxu1 %v684_v0  ;;  %473 = vperm.xlu0 %682, %v463_v55   ;;  %v888_v9 = vld [vmem:[%s1071_s1 + $0x18] sm:$0xff]  ;;  %v630_v10 = vpack.c.bf16 %v531_v6, %v530_v5  ;;  %v657_v12 = vpack.c.bf16 %v553_v8, %v552_v7  ;;  %v532_v13 = vld [vmem:[%s1070_s0 + $0x140] sm:$0xff]  ;;  %v533_v14 = vld [vmem:[%s1070_s0 + $0x148] sm:$0xff] }
  0x13   :  { %483 = vperm.xlu1 %683, %v465_v58   ;;  %v554_v15 = vld [vmem:[%s1070_s0 + $0x1d0] sm:$0xff]  ;;  %v555_v16 = vld [vmem:[%s1070_s0 + $0x1d8] sm:$0xff]  ;;  %v918_v17 = vld [vmem:[%s1071_s1 + $0x28] sm:$0xff]  ;;  %v633_v18 = vpack.c.bf16 %v533_v14, %v532_v13 }
  0x14   :  { %586 = vmatpush1.bf16.msra.mxu0 %v585_v31  ;;  %v924_v19 = vld [vmem:[%s1071_s1 + $0x20] sm:$0xff]  ;;  %v660_v20 = vpack.c.bf16 %v555_v16, %v554_v15  ;;  %v534_v21 = vld [vmem:[%s1070_s0 + $0x150] sm:$0xff]  ;;  %v535_v22 = vld [vmem:[%s1070_s0 + $0x158] sm:$0xff] }
  0x15   :  { %613 = vmatpush1.bf16.msra.mxu1 %v612_v32  ;;  %587 = vmatprep.subr.bf16.mxu0 %v684_v0  ;;  %v556_v23 = vld [vmem:[%s1070_s0 + $0x1e0] sm:$0xff]  ;;  %v557_v24 = vld [vmem:[%s1070_s0 + $0x1e8] sm:$0xff]  ;;  %v948_v25 = vld [vmem:[%s1071_s1 + $0x38] sm:$0xff]  ;;  %v636_v26 = vpack.c.bf16 %v535_v22, %v534_v21 }
  0x16   :  { %614 = vmatprep.subr.bf16.mxu1 %v684_v0  ;;  %v954_v27 = vld [vmem:[%s1071_s1 + $0x30] sm:$0xff]  ;;  %v663_v29 = vpack.c.bf16 %v557_v24, %v556_v23  ;;  %v536_v30 = vld [vmem:[%s1070_s0 + $0x160] sm:$0xff]  ;;  %v537_v31 = vld [vmem:[%s1070_s0 + $0x168] sm:$0xff] }
  0x17   :  { %v558_v32 = vld [vmem:[%s1070_s0 + $0x1f0] sm:$0xff]  ;;  %v559_v33 = vld [vmem:[%s1070_s0 + $0x1f8] sm:$0xff]  ;;  %v639_v34 = vpack.c.bf16 %v537_v31, %v536_v30  ;;  %v561_v39 = vld [vmem:[%s1070_s0 + $0x208] sm:$0xff] }
  0x18   :  { %589 = vmatpush1.bf16.msra.mxu0 %v588_v37  ;;  %v666_v35 = vpack.c.bf16 %v559_v33, %v558_v32  ;;  %v538_v36 = vld [vmem:[%s1070_s0 + $0x170] sm:$0xff]  ;;  %v539_v37 = vld [vmem:[%s1070_s0 + $0x178] sm:$0xff]  ;;  %v540_v42 = vld [vmem:[%s1070_s0 + $0x180] sm:$0xff] }
  0x19   :  { %616 = vmatpush1.bf16.msra.mxu1 %v615_v38  ;;  %590 = vmatprep.subr.bf16.mxu0 %v684_v0  ;;  %v560_v38 = vld [vmem:[%s1070_s0 + $0x200] sm:$0xff]  ;;  %v642_v40 = vpack.c.bf16 %v539_v37, %v538_v36  ;;  %v542_v47 = vld [vmem:[%s1070_s0 + $0x190] sm:$0xff]  ;;  %v543_v48 = vld [vmem:[%s1070_s0 + $0x198] sm:$0xff] }
  0x1a   :  { %617 = vmatprep.subr.bf16.mxu1 %v684_v0  ;;  %v669_v41 = vpack.c.bf16 %v561_v39, %v560_v38  ;;  %v564_v49 = vld [vmem:[%s1070_s0 + $0x220] sm:$0xff]  ;;  %v648_v51 = vpack.c.bf16 %v543_v48, %v542_v47  ;;  %v545_v54 = vld [vmem:[%s1070_s0 + $0x1a8] sm:$0xff]  ;;  %v566_v55 = vld [vmem:[%s1070_s0 + $0x230] sm:$0xff] }
  0x1b   :  { %v544_v53 = vld [vmem:[%s1070_s0 + $0x1a0] sm:$0xff]  ;;  %v567_v56 = vld [vmem:[%s1070_s0 + $0x238] sm:$0xff] }
  0x1c   :  { %592 = vmatpush1.bf16.msra.mxu0 %v591_v43  ;;  %v541_v43 = vld [vmem:[%s1070_s0 + $0x188] sm:$0xff]  ;;  %v651_v57 = vpack.c.bf16 %v545_v54, %v544_v53  ;;  %v678_v58 = vpack.c.bf16 %v567_v56, %v566_v55 }
  0x1d   :  { %619 = vmatpush1.bf16.msra.mxu1 %v618_v44  ;;  %593 = vmatprep.subr.bf16.mxu0 %v684_v0  ;;  %v563_v44 = vld [vmem:[%s1070_s0 + $0x218] sm:$0xff]  ;;  %v645_v45 = vpack.c.bf16 %v541_v43, %v540_v42 }
  0x1e   :  { %620 = vmatprep.subr.bf16.mxu1 %v684_v0 }
  0x20   :  { %595 = vmatpush1.bf16.msra.mxu0 %v594_v50  ;;  %v565_v50 = vld [vmem:[%s1070_s0 + $0x228] sm:$0xff] }
  0x21   :  { %622 = vmatpush1.bf16.msra.mxu1 %v621_v52  ;;  %596 = vmatprep.subr.bf16.mxu0 %v684_v0  ;;  %v675_v52 = vpack.c.bf16 %v565_v50, %v564_v49 }
  0x22   :  { %623 = vmatprep.subr.bf16.mxu1 %v684_v0 }
  0x24   :  { %598 = vmatpush1.bf16.msra.mxu0 %v597_v59 }
  0x25   :  { %625 = vmatpush1.bf16.msra.mxu1 %v624_v60  ;;  %626 = vmatprep.subr.bf16.mxu0 %v684_v0 }
  0x26   :  { %653 = vmatprep.subr.bf16.mxu1 %v684_v0 }
  0x27   :  { %118 = vmatmul.mubr.f32.vlgmr.msra.gmra.mrb[0].mxu0 %v868_v2 }
  0x28   :  { %222 = vmatmul.mubr.f32.vlgmr.msra.gmra.mrb[0].mxu1 %v868_v2  ;;  %628 = vmatpush1.bf16.msra.mxu0 %v627_v3 }
  0x29   :  { %655 = vmatpush1.bf16.msra.mxu1 %v654_v4  ;;  %629 = vmatprep.subr.bf16.mxu0 %v684_v0 }
  0x2a   :  { %656 = vmatprep.subr.bf16.mxu1 %v684_v0  ;;  %503 = vmatprep.mubr.msk.f32.mxu0 %vm40_vm0, %v888_v9 }
  0x2b   :  { %123 = vmatmul.mubr.f32.gmra.mrb[2].mxu0 %v894_v11  ;;  %525 = vmatprep.mubr.msk.f32.mxu1 %vm40_vm0, %v888_v9 }
  0x2c   :  { %631 = vmatpush1.bf16.msra.mxu0 %v630_v10  ;;  %227 = vmatmul.mubr.f32.gmra.mrb[2].mxu1 %v894_v11 }
  0x2d   :  { %658 = vmatpush1.bf16.msra.mxu1 %v657_v12  ;;  %632 = vmatprep.subr.bf16.mxu0 %v684_v0 }
  0x2e   :  { %659 = vmatprep.subr.bf16.mxu1 %v684_v0  ;;  %504 = vmatprep.mubr.msk.f32.mxu0 %vm40_vm0, %v918_v17 }
  0x2f   :  { %128 = vmatmul.mubr.f32.gmra.mrb[4].mxu0 %v924_v19  ;;  %526 = vmatprep.mubr.msk.f32.mxu1 %vm40_vm0, %v918_v17 }
  0x30   :  { %634 = vmatpush1.bf16.msra.mxu0 %v633_v18  ;;  %232 = vmatmul.mubr.f32.gmra.mrb[4].mxu1 %v924_v19 }
  0x31   :  { %661 = vmatpush1.bf16.msra.mxu1 %v660_v20  ;;  %635 = vmatprep.subr.bf16.mxu0 %v684_v0 }
  0x32   :  { %662 = vmatprep.subr.bf16.mxu1 %v684_v0  ;;  %505 = vmatprep.mubr.msk.f32.mxu0 %vm40_vm0, %v948_v25 }
  0x33   :  { %133 = vmatmul.mubr.f32.gmra.mrb[6].mxu0 %v954_v27  ;;  %527 = vmatprep.mubr.msk.f32.mxu1 %vm40_vm0, %v948_v25 }
  0x34   :  { %637 = vmatpush1.bf16.msra.mxu0 %v636_v26  ;;  %237 = vmatmul.mubr.f32.gmra.mrb[6].mxu1 %v954_v27 }
  0x35   :  { %664 = vmatpush1.bf16.msra.mxu1 %v663_v29  ;;  %638 = vmatprep.subr.bf16.mxu0 %v684_v0 }
  0x36   :  { %665 = vmatprep.subr.bf16.mxu1 %v684_v0  ;;  %546 = vmatprep.mubr.msk.f32.mxu0 %vm40_vm0, %v770_v28 }
  0x37   :  { %568 = vmatprep.mubr.msk.f32.mxu1 %vm40_vm0, %v770_v28  ;;  %v562_v28 = vld [vmem:[%s1070_s0 + $0x210] sm:$0xff] }
  0x38   :  { %640 = vmatpush1.bf16.msra.mxu0 %v639_v34  ;;  %v672_v46 = vpack.c.bf16 %v563_v44, %v562_v28 }
  0x39   :  { %667 = vmatpush1.bf16.msra.mxu1 %v666_v35  ;;  %641 = vmatprep.subr.bf16.mxu0 %v684_v0 }
  0x3a   :  { %668 = vmatprep.subr.bf16.mxu1 %v684_v0 }
  0x3c   :  { %643 = vmatpush1.bf16.msra.mxu0 %v642_v40 }
  0x3d   :  { %670 = vmatpush1.bf16.msra.mxu1 %v669_v41  ;;  %644 = vmatprep.subr.bf16.mxu0 %v684_v0 }
  0x3e   :  { %671 = vmatprep.subr.bf16.mxu1 %v684_v0 }
  0x40   :  { %646 = vmatpush1.bf16.msra.mxu0 %v645_v45 }
  0x41   :  { %673 = vmatpush1.bf16.msra.mxu1 %v672_v46  ;;  %647 = vmatprep.subr.bf16.mxu0 %v684_v0 }
  0x42   :  { %674 = vmatprep.subr.bf16.mxu1 %v684_v0 }
  0x44   :  { %649 = vmatpush1.bf16.msra.mxu0 %v648_v51 }
  0x45   :  { %676 = vmatpush1.bf16.msra.mxu1 %v675_v52  ;;  %650 = vmatprep.subr.bf16.mxu0 %v684_v0 }
  0x46   :  { %677 = vmatprep.subr.bf16.mxu1 %v684_v0 }
  0x48   :  { %652 = vmatpush1.bf16.msra.mxu0 %v651_v57 }
  0x49   :  { %679 = vmatpush1.bf16.msra.mxu1 %v678_v58 }
  0x4b   :  { %330 = vmatmul.mubr.f32.vlgmr.msra.gmra.mrb[8].mxu0 %v868_v2 }
  0x4c   :  { %438 = vmatmul.mubr.f32.vlgmr.msra.gmra.mrb[8].mxu1 %v868_v2  ;;  %547 = vmatprep.mubr.msk.f32.mxu0 %vm40_vm0, %v888_v9 }
  0x4d   :  { %569 = vmatprep.mubr.msk.f32.mxu1 %vm40_vm0, %v888_v9 }
  0x4f   :  { %335 = vmatmul.mubr.f32.gmra.mrb[10].mxu0 %v894_v11 }
  0x50   :  { %443 = vmatmul.mubr.f32.gmra.mrb[10].mxu1 %v894_v11  ;;  %548 = vmatprep.mubr.msk.f32.mxu0 %vm40_vm0, %v918_v17 }
  0x51   :  { %570 = vmatprep.mubr.msk.f32.mxu1 %vm40_vm0, %v918_v17 }
  0x53   :  { %340 = vmatmul.mubr.f32.gmra.mrb[12].mxu0 %v924_v19 }
  0x54   :  { %448 = vmatmul.mubr.f32.gmra.mrb[12].mxu1 %v924_v19  ;;  %549 = vmatprep.mubr.msk.f32.mxu0 %vm40_vm0, %v948_v25 }
  0x55   :  { %571 = vmatprep.mubr.msk.f32.mxu1 %vm40_vm0, %v948_v25 }
  0x57   :  { %345 = vmatmul.mubr.f32.gmra.mrb[14].mxu0 %v954_v27 }
  0x58   :  { %453 = vmatmul.mubr.f32.gmra.mrb[14].mxu1 %v954_v27 }
  0x8d   :  { %v469_v16 = vpop.permute.xlu0 %468 }
  0x8e   :  { %v479_v37 = vpop.permute.xlu1 %478 }
  0x91   :  { %v474_v29 = vpop.permute.xlu0 %473 }
  0x92   :  { %v484_v48 = vpop.permute.xlu1 %483 }
  0xfa   :  { %v119_v0 = vpop.f32.mrb[0].mxu0 }
  0xfb   :  { %v121_v59 = vpop.f32.mrb[1].mxu0  ;;  %v223_v60 = vpop.f32.mrb[0].mxu1 }
  0xfc   :  { %v242_v61 = vmax.f32 %v119_v0, %v223_v60  ;;  %v225_v62 = vpop.f32.mrb[1].mxu1 }
  0xfe   :  { %v124_v63 = vpop.f32.mrb[2].mxu0 }
  0xff   :  { %v126_v1 = vpop.f32.mrb[3].mxu0  ;;  %v228_v2 = vpop.f32.mrb[2].mxu1 }
 0x100   :  { %v243_v3 = vmax.f32 %v124_v63, %v228_v2  ;;  %v230_v4 = vpop.f32.mrb[3].mxu1 }
 0x102   :  { %v129_v5 = vpop.f32.mrb[4].mxu0 }
 0x103   :  { %v131_v6 = vpop.f32.mrb[5].mxu0  ;;  %v233_v7 = vpop.f32.mrb[4].mxu1 }
 0x104   :  { %v244_v8 = vmax.f32 %v129_v5, %v233_v7  ;;  %v235_v9 = vpop.f32.mrb[5].mxu1 }
 0x106   :  { %v134_v10 = vpop.f32.mrb[6].mxu0 }
 0x107   :  { %v136_v11 = vpop.f32.mrb[7].mxu0  ;;  %v238_v12 = vpop.f32.mrb[6].mxu1 }
 0x108   :  { %v245_v13 = vmax.f32 %v134_v10, %v238_v12  ;;  %v240_v14 = vpop.f32.mrb[7].mxu1 }
 0x11e   :  { %v331_v15 = vpop.f32.mrb[8].mxu0 }
 0x11f   :  { %v350_v17 = vmax.f32 %v242_v61, %v331_v15  ;;  %v333_v18 = vpop.f32.mrb[9].mxu0  ;;  %v439_v19 = vpop.f32.mrb[8].mxu1 }
 0x120   :  { %v441_v20 = vpop.f32.mrb[9].mxu1 }
 0x121   :  { %v458_v21 = vmax.f32 %v350_v17, %v439_v19 }
 0x122   :  { %v336_v22 = vpop.f32.mrb[10].mxu0 }
 0x123   :  { %v486_v23 = vadd.f32 %v469_v16, %v458_v21  ;;  %v351_v24 = vmax.f32 %v243_v3, %v336_v22  ;;  %v338_v25 = vpop.f32.mrb[11].mxu0  ;;  %v444_v26 = vpop.f32.mrb[10].mxu1 }
 0x124   :  { %v446_v27 = vpop.f32.mrb[11].mxu1 }
 0x125   :  { %v490_v30 = vmax.f32 %v486_v23, 0.0  ;;  %v459_v31 = vmax.f32 %v351_v24, %v444_v26 }
 0x126   :  { %v341_v32 = vpop.f32.mrb[12].mxu0 }
 0x127   :  { %494 = vst [vmem:[%s1073_s3] sm:$0xff] %v490_v30  ;;  %v487_v33 = vadd.f32 %v474_v29, %v459_v31  ;;  %v352_v34 = vmax.f32 %v244_v8, %v341_v32  ;;  %v343_v35 = vpop.f32.mrb[13].mxu0  ;;  %v449_v36 = vpop.f32.mrb[12].mxu1 }
 0x128   :  { %v451_v38 = vpop.f32.mrb[13].mxu1 }
 0x129   :  { %v491_v39 = vmax.f32 %v487_v33, 0.0  ;;  %v460_v40 = vmax.f32 %v352_v34, %v449_v36 }
 0x12a   :  { %v346_v41 = vpop.f32.mrb[14].mxu0 }
 0x12b   :  { %495 = vst [vmem:[%s1073_s3 + $0x8] sm:$0xff] %v491_v39  ;;  %v488_v42 = vadd.f32 %v479_v37, %v460_v40  ;;  %v353_v43 = vmax.f32 %v245_v13, %v346_v41  ;;  %v348_v28 = vpop.f32.mrb[15].mxu0  ;;  %v454_v44 = vpop.f32.mrb[14].mxu1 }
 0x12c   :  { %v456_v45 = vpop.f32.mrb[15].mxu1 }
 0x12d   :  { %v492_v46 = vmax.f32 %v488_v42, 0.0  ;;  %v461_v47 = vmax.f32 %v353_v43, %v454_v44 }
 0x12f   :  { %496 = vst [vmem:[%s1073_s3 + $0x10] sm:$0xff] %v492_v46  ;;  %v489_v49 = vadd.f32 %v484_v48, %v461_v47 }
 0x131   :  { %v493_v50 = vmax.f32 %v489_v49, 0.0 }
 0x133   :  { %497 = vst [vmem:[%s1073_s3 + $0x18] sm:$0xff] %v493_v50 }

// kernel: convnet_forward.5
= control target key start
LH: loop header
LB: loop body
LE: loop exit
PB: predicated region body
PF: predicated region fallthrough
CT: control target
= control target key end

     0   :  { %v1914_v7 = vmov 0   ;;  %vm1916_vm0 = vmmov 0   ;;  %vm321_vm1 = vcmask 261120   ;;  %vm1019_vm2 = vcmask 982016   ;;  %s2837_s0 = inlined_call_operand.vmem [shape: f32[800,128], index: 0, kind: input, shape index: {}]   ;;  %s2838_s1 = inlined_call_operand.vmem [shape: f32[120,800], index: 1, kind: input, shape index: {}]   ;;  %s2839_s2 = inlined_call_operand.vmem [shape: f32[120,1], index: 2, kind: input, shape index: {}]   ;;  %s2840_s4 = inlined_call_operand.vmem [shape: f32[84,1], index: 4, kind: input, shape index: {}]   ;;  %s2841_s6 = inlined_call_operand.vmem [shape: f32[10,1], index: 6, kind: input, shape index: {}]   ;;  %s2842_s3 = inlined_call_operand.vmem [shape: f32[84,120], index: 3, kind: input, shape index: {}]   ;;  %s2843_s5 = inlined_call_operand.vmem [shape: f32[10,84], index: 5, kind: input, shape index: {}]   ;;  %s2844_s7 = inlined_call_operand.vmem [shape: f32[10,128], index: 7, kind: output, shape index: {}]  }
   0x1   :  { %v147_v0 = vld [vmem:[%s2837_s0 + $0x80] sm:$0xff]  ;;  %v148_v1 = vld [vmem:[%s2837_s0 + $0x88] sm:$0xff]  ;;  %1912 = vset.pattern.permute.xlu0 %v1914_v7  ;;  %1913 = vset.pattern.permute.xlu1 %v1914_v7  ;;  %v149_v12 = vld [vmem:[%s2837_s0 + $0x90] sm:$0xff]  ;;  %vm1198_vm3 = vcmask 687104   ;;  %vm1205_vm4 = vcmask 1043456  }
   0x2   :  { %v179_v2 = vld [vmem:[%s2837_s0 + $0x180] sm:$0xff]  ;;  %v1749_v3 = vpack.c.bf16 %v148_v1, %v147_v0  ;;  %v180_v4 = vld [vmem:[%s2837_s0 + $0x188] sm:$0xff]  ;;  %v150_v14 = vld [vmem:[%s2837_s0 + $0x98] sm:$0xff] }
   0x3   :  { %v131_v5 = vld [vmem:[%s2837_s0] sm:$0xff]  ;;  %v132_v6 = vld [vmem:[%s2837_s0 + $0x8] sm:$0xff]  ;;  %v1781_v8 = vpack.c.bf16 %v180_v4, %v179_v2  ;;  %v181_v15 = vld [vmem:[%s2837_s0 + $0x190] sm:$0xff]  ;;  %v1753_v17 = vpack.c.bf16 %v150_v14, %v149_v12 }
   0x4   :  { %v1751_v9 = vpack.c.bf16 %v132_v6, %v131_v5  ;;  %v163_v10 = vld [vmem:[%s2837_s0 + $0x100] sm:$0xff]  ;;  %v164_v11 = vld [vmem:[%s2837_s0 + $0x108] sm:$0xff]  ;;  %1750 = vmatprep.subr.bf16.mxu0 %v1749_v3  ;;  %v182_v16 = vld [vmem:[%s2837_s0 + $0x198] sm:$0xff] }
   0x5   :  { %v1783_v13 = vpack.c.bf16 %v164_v11, %v163_v10  ;;  %1782 = vmatprep.subr.bf16.mxu1 %v1781_v8  ;;  %v1785_v18 = vpack.c.bf16 %v182_v16, %v181_v15  ;;  %v133_v19 = vld [vmem:[%s2837_s0 + $0x10] sm:$0xff]  ;;  %v134_v20 = vld [vmem:[%s2837_s0 + $0x18] sm:$0xff]  ;;  %v151_v24 = vld [vmem:[%s2837_s0 + $0xa0] sm:$0xff] }
   0x6   :  { %1752 = vmatpush3.bf16.msra.mxu0 %v1751_v9  ;;  %v165_v21 = vld [vmem:[%s2837_s0 + $0x110] sm:$0xff]  ;;  %v1755_v22 = vpack.c.bf16 %v134_v20, %v133_v19  ;;  %v166_v23 = vld [vmem:[%s2837_s0 + $0x118] sm:$0xff]  ;;  %v152_v25 = vld [vmem:[%s2837_s0 + $0xa8] sm:$0xff] }
   0x7   :  { %1784 = vmatpush3.bf16.msra.mxu1 %v1783_v13  ;;  %1754 = vmatprep.subr.bf16.mxu0 %v1753_v17  ;;  %v1787_v26 = vpack.c.bf16 %v166_v23, %v165_v21  ;;  %v1757_v27 = vpack.c.bf16 %v152_v25, %v151_v24  ;;  %v183_v28 = vld [vmem:[%s2837_s0 + $0x1a0] sm:$0xff]  ;;  %v184_v29 = vld [vmem:[%s2837_s0 + $0x1a8] sm:$0xff]  ;;  %v153_v36 = vld [vmem:[%s2837_s0 + $0xb0] sm:$0xff] }
   0x8   :  { %1786 = vmatprep.subr.bf16.mxu1 %v1785_v18  ;;  %v135_v30 = vld [vmem:[%s2837_s0 + $0x20] sm:$0xff]  ;;  %v1789_v31 = vpack.c.bf16 %v184_v29, %v183_v28  ;;  %v136_v32 = vld [vmem:[%s2837_s0 + $0x28] sm:$0xff]  ;;  %v154_v37 = vld [vmem:[%s2837_s0 + $0xb8] sm:$0xff] }
   0x9   :  { %v167_v33 = vld [vmem:[%s2837_s0 + $0x120] sm:$0xff]  ;;  %v168_v34 = vld [vmem:[%s2837_s0 + $0x128] sm:$0xff]  ;;  %v1759_v35 = vpack.c.bf16 %v136_v32, %v135_v30  ;;  %v185_v38 = vld [vmem:[%s2837_s0 + $0x1b0] sm:$0xff]  ;;  %v1761_v40 = vpack.c.bf16 %v154_v37, %v153_v36 }
   0xa   :  { %1756 = vmatpush3.bf16.msra.mxu0 %v1755_v22  ;;  %v1791_v39 = vpack.c.bf16 %v168_v34, %v167_v33  ;;  %v186_v41 = vld [vmem:[%s2837_s0 + $0x1b8] sm:$0xff]  ;;  %v137_v42 = vld [vmem:[%s2837_s0 + $0x30] sm:$0xff]  ;;  %v155_v47 = vld [vmem:[%s2837_s0 + $0xc0] sm:$0xff] }
   0xb   :  { %1788 = vmatpush3.bf16.msra.mxu1 %v1787_v26  ;;  %1758 = vmatprep.subr.bf16.mxu0 %v1757_v27  ;;  %v138_v43 = vld [vmem:[%s2837_s0 + $0x38] sm:$0xff]  ;;  %v1793_v44 = vpack.c.bf16 %v186_v41, %v185_v38  ;;  %v169_v45 = vld [vmem:[%s2837_s0 + $0x130] sm:$0xff]  ;;  %v156_v48 = vld [vmem:[%s2837_s0 + $0xc8] sm:$0xff] }
   0xc   :  { %1790 = vmatprep.subr.bf16.mxu1 %v1789_v31  ;;  %v170_v46 = vld [vmem:[%s2837_s0 + $0x138] sm:$0xff]  ;;  %v187_v49 = vld [vmem:[%s2837_s0 + $0x1c0] sm:$0xff]  ;;  %v188_v50 = vld [vmem:[%s2837_s0 + $0x1c8] sm:$0xff]  ;;  %v1763_v51 = vpack.c.bf16 %v138_v43, %v137_v42  ;;  %v1765_v53 = vpack.c.bf16 %v156_v48, %v155_v47 }
   0xd   :  { %v1795_v52 = vpack.c.bf16 %v170_v46, %v169_v45  ;;  %v139_v54 = vld [vmem:[%s2837_s0 + $0x40] sm:$0xff]  ;;  %v140_v55 = vld [vmem:[%s2837_s0 + $0x48] sm:$0xff]  ;;  %v1797_v57 = vpack.c.bf16 %v188_v50, %v187_v49  ;;  %v157_v59 = vld [vmem:[%s2837_s0 + $0xd0] sm:$0xff] }
   0xe   :  { %1760 = vmatpush3.bf16.msra.mxu0 %v1759_v35  ;;  %v171_v56 = vld [vmem:[%s2837_s0 + $0x140] sm:$0xff]  ;;  %v172_v58 = vld [vmem:[%s2837_s0 + $0x148] sm:$0xff]  ;;  %v158_v60 = vld [vmem:[%s2837_s0 + $0xd8] sm:$0xff]  ;;  %v1767_v63 = vpack.c.bf16 %v140_v55, %v139_v54 }
   0xf   :  { %1792 = vmatpush3.bf16.msra.mxu1 %v1791_v39  ;;  %1762 = vmatprep.subr.bf16.mxu0 %v1761_v40  ;;  %v189_v61 = vld [vmem:[%s2837_s0 + $0x1d0] sm:$0xff]  ;;  %v190_v62 = vld [vmem:[%s2837_s0 + $0x1d8] sm:$0xff]  ;;  %v1799_v0 = vpack.c.bf16 %v172_v58, %v171_v56  ;;  %v1769_v1 = vpack.c.bf16 %v158_v60, %v157_v59  ;;  %v159_v7 = vld [vmem:[%s2837_s0 + $0xe0] sm:$0xff] }
  0x10   :  { %1794 = vmatprep.subr.bf16.mxu1 %v1793_v44  ;;  %v141_v2 = vld [vmem:[%s2837_s0 + $0x50] sm:$0xff]  ;;  %v142_v3 = vld [vmem:[%s2837_s0 + $0x58] sm:$0xff]  ;;  %v1801_v5 = vpack.c.bf16 %v190_v62, %v189_v61  ;;  %v160_v8 = vld [vmem:[%s2837_s0 + $0xe8] sm:$0xff] }
  0x11   :  { %v173_v4 = vld [vmem:[%s2837_s0 + $0x150] sm:$0xff]  ;;  %v174_v6 = vld [vmem:[%s2837_s0 + $0x158] sm:$0xff]  ;;  %v191_v9 = vld [vmem:[%s2837_s0 + $0x1e0] sm:$0xff]  ;;  %v1771_v11 = vpack.c.bf16 %v142_v3, %v141_v2  ;;  %v1773_v15 = vpack.c.bf16 %v160_v8, %v159_v7 }
  0x12   :  { %1764 = vmatpush3.bf16.msra.mxu0 %v1763_v51  ;;  %v192_v10 = vld [vmem:[%s2837_s0 + $0x1e8] sm:$0xff]  ;;  %v143_v12 = vld [vmem:[%s2837_s0 + $0x60] sm:$0xff]  ;;  %v1803_v14 = vpack.c.bf16 %v174_v6, %v173_v4  ;;  %v29_v18 = vld [vmem:[%s2838_s1 + $0x18] sm:$0xff] }
  0x13   :  { %1796 = vmatpush3.bf16.msra.mxu1 %v1795_v52  ;;  %1766 = vmatprep.subr.bf16.mxu0 %v1765_v53  ;;  %v144_v13 = vld [vmem:[%s2837_s0 + $0x68] sm:$0xff]  ;;  %v175_v16 = vld [vmem:[%s2837_s0 + $0x160] sm:$0xff]  ;;  %v1805_v19 = vpack.c.bf16 %v192_v10, %v191_v9  ;;  %v161_v21 = vld [vmem:[%s2837_s0 + $0xf0] sm:$0xff] }
  0x14   :  { %1798 = vmatprep.subr.bf16.mxu1 %v1797_v57  ;;  %v27_v17 = vld [vmem:[%s2838_s1 + $0x8] sm:$0xff]  ;;  %v162_v22 = vld [vmem:[%s2837_s0 + $0xf8] sm:$0xff]  ;;  %v193_v23 = vld [vmem:[%s2837_s0 + $0x1f0] sm:$0xff]  ;;  %571 = vmatprep.mubr.f32.mxu1 %v29_v18  ;;  %v1775_v25 = vpack.c.bf16 %v144_v13, %v143_v12 }
  0x15   :  { %v176_v20 = vld [vmem:[%s2837_s0 + $0x168] sm:$0xff]  ;;  %431 = vmatprep.mubr.f32.mxu0 %v27_v17  ;;  %v194_v24 = vld [vmem:[%s2837_s0 + $0x1f8] sm:$0xff]  ;;  %v1777_v27 = vpack.c.bf16 %v162_v22, %v161_v21  ;;  %v145_v28 = vld [vmem:[%s2837_s0 + $0x70] sm:$0xff] }
  0x16   :  { %1768 = vmatpush3.bf16.msra.mxu0 %v1767_v63  ;;  %v1807_v26 = vpack.c.bf16 %v176_v20, %v175_v16  ;;  %v146_v29 = vld [vmem:[%s2837_s0 + $0x78] sm:$0xff]  ;;  %v1809_v30 = vpack.c.bf16 %v194_v24, %v193_v23  ;;  %v177_v31 = vld [vmem:[%s2837_s0 + $0x170] sm:$0xff]  ;;  %v211_v35 = vld [vmem:[%s2837_s0 + $0x280] sm:$0xff] }
  0x17   :  { %1800 = vmatpush3.bf16.msra.mxu1 %v1799_v0  ;;  %1770 = vmatprep.subr.bf16.mxu0 %v1769_v1  ;;  %v178_v32 = vld [vmem:[%s2837_s0 + $0x178] sm:$0xff]  ;;  %v1779_v33 = vpack.c.bf16 %v146_v29, %v145_v28  ;;  %v212_v36 = vld [vmem:[%s2837_s0 + $0x288] sm:$0xff]  ;;  %v195_v38 = vld [vmem:[%s2837_s0 + $0x200] sm:$0xff] }
  0x18   :  { %1802 = vmatprep.subr.bf16.mxu1 %v1801_v5  ;;  %v1811_v34 = vpack.c.bf16 %v178_v32, %v177_v31  ;;  %v1813_v37 = vpack.c.bf16 %v212_v36, %v211_v35  ;;  %v196_v39 = vld [vmem:[%s2837_s0 + $0x208] sm:$0xff]  ;;  %v26_v40 = vld [vmem:[%s2838_s1] sm:$0xff]  ;;  %v28_v41 = vld [vmem:[%s2838_s1 + $0x10] sm:$0xff] }
  0x19   :  { %v34_v42 = vld [vmem:[%s2838_s1 + $0x40] sm:$0xff]  ;;  %v1815_v43 = vpack.c.bf16 %v196_v39, %v195_v38  ;;  %v213_v44 = vld [vmem:[%s2837_s0 + $0x290] sm:$0xff]  ;;  %v214_v45 = vld [vmem:[%s2837_s0 + $0x298] sm:$0xff] }
  0x1a   :  { %1772 = vmatpush3.bf16.msra.mxu0 %v1771_v11  ;;  %v36_v46 = vld [vmem:[%s2838_s1 + $0x50] sm:$0xff]  ;;  %v1817_v47 = vpack.c.bf16 %v214_v45, %v213_v44  ;;  %v198_v49 = vld [vmem:[%s2837_s0 + $0x218] sm:$0xff]  ;;  %v35_v51 = vld [vmem:[%s2838_s1 + $0x48] sm:$0xff] }
  0x1b   :  { %1804 = vmatpush3.bf16.msra.mxu1 %v1803_v14  ;;  %1774 = vmatprep.subr.bf16.mxu0 %v1773_v15  ;;  %v197_v48 = vld [vmem:[%s2837_s0 + $0x210] sm:$0xff]  ;;  %v33_v50 = vld [vmem:[%s2838_s1 + $0x38] sm:$0xff]  ;;  %v215_v54 = vld [vmem:[%s2837_s0 + $0x2a0] sm:$0xff] }
  0x1c   :  { %1806 = vmatprep.subr.bf16.mxu1 %v1805_v19  ;;  %v41_v52 = vld [vmem:[%s2838_s1 + $0x78] sm:$0xff]  ;;  %v1819_v53 = vpack.c.bf16 %v198_v49, %v197_v48  ;;  %v216_v55 = vld [vmem:[%s2837_s0 + $0x2a8] sm:$0xff]  ;;  %v199_v58 = vld [vmem:[%s2837_s0 + $0x220] sm:$0xff] }
  0x1d   :  { %v43_v56 = vld [vmem:[%s2838_s1 + $0x88] sm:$0xff]  ;;  %v1821_v57 = vpack.c.bf16 %v216_v55, %v215_v54  ;;  %v40_v60 = vld [vmem:[%s2838_s1 + $0x70] sm:$0xff]  ;;  %v218_v62 = vld [vmem:[%s2837_s0 + $0x2b8] sm:$0xff] }
  0x1e   :  { %1776 = vmatpush3.bf16.msra.mxu0 %v1775_v25  ;;  %v200_v59 = vld [vmem:[%s2837_s0 + $0x228] sm:$0xff]  ;;  %v217_v61 = vld [vmem:[%s2837_s0 + $0x2b0] sm:$0xff]  ;;  %v42_v63 = vld [vmem:[%s2838_s1 + $0x80] sm:$0xff] }
  0x1f   :  { %1808 = vmatpush3.bf16.msra.mxu1 %v1807_v26  ;;  %1778 = vmatprep.subr.bf16.mxu0 %v1777_v27  ;;  %v48_v0 = vld [vmem:[%s2838_s1 + $0xb0] sm:$0xff]  ;;  %v1823_v1 = vpack.c.bf16 %v200_v59, %v199_v58  ;;  %v50_v2 = vld [vmem:[%s2838_s1 + $0xc0] sm:$0xff]  ;;  %v1825_v3 = vpack.c.bf16 %v218_v62, %v217_v61  ;;  %v202_v5 = vld [vmem:[%s2837_s0 + $0x238] sm:$0xff] }
  0x20   :  { %1810 = vmatprep.subr.bf16.mxu1 %v1809_v30  ;;  %v201_v4 = vld [vmem:[%s2837_s0 + $0x230] sm:$0xff]  ;;  %v219_v6 = vld [vmem:[%s2837_s0 + $0x2c0] sm:$0xff]  ;;  %v220_v7 = vld [vmem:[%s2837_s0 + $0x2c8] sm:$0xff] }
  0x21   :  { %v47_v8 = vld [vmem:[%s2838_s1 + $0xa8] sm:$0xff]  ;;  %v49_v9 = vld [vmem:[%s2838_s1 + $0xb8] sm:$0xff]  ;;  %v1827_v11 = vpack.c.bf16 %v202_v5, %v201_v4  ;;  %v1829_v13 = vpack.c.bf16 %v220_v7, %v219_v6  ;;  %v203_v14 = vld [vmem:[%s2837_s0 + $0x240] sm:$0xff] }
  0x22   :  { %1780 = vmatpush3.bf16.msra.mxu0 %v1779_v33  ;;  %v55_v10 = vld [vmem:[%s2838_s1 + $0xe8] sm:$0xff]  ;;  %v57_v12 = vld [vmem:[%s2838_s1 + $0xf8] sm:$0xff]  ;;  %v221_v16 = vld [vmem:[%s2837_s0 + $0x2d0] sm:$0xff] }
  0x23   :  { %1812 = vmatpush3.bf16.msra.mxu1 %v1811_v34  ;;  %1814 = vmatprep.subr.bf16.mxu0 %v1813_v37  ;;  %v204_v15 = vld [vmem:[%s2837_s0 + $0x248] sm:$0xff]  ;;  %v222_v17 = vld [vmem:[%s2837_s0 + $0x2d8] sm:$0xff]  ;;  %v54_v18 = vld [vmem:[%s2838_s1 + $0xe0] sm:$0xff] }
  0x24   :  { %1892 = vmatprep.subr.bf16.mxu1 %v1813_v37  ;;  %v56_v19 = vld [vmem:[%s2838_s1 + $0xf0] sm:$0xff]  ;;  %v62_v20 = vld [vmem:[%s2838_s1 + $0x120] sm:$0xff]  ;;  %v1831_v21 = vpack.c.bf16 %v204_v15, %v203_v14  ;;  %v1833_v23 = vpack.c.bf16 %v222_v17, %v221_v16  ;;  %v206_v25 = vld [vmem:[%s2837_s0 + $0x258] sm:$0xff] }
  0x25   :  { %432 = vmatmul.mubr.f32.vlgmr.msra.gmra.mrb[0].mxu0 %v26_v40  ;;  %v64_v22 = vld [vmem:[%s2838_s1 + $0x130] sm:$0xff]  ;;  %v223_v26 = vld [vmem:[%s2837_s0 + $0x2e0] sm:$0xff]  ;;  %v224_v27 = vld [vmem:[%s2837_s0 + $0x2e8] sm:$0xff] }
  0x26   :  { %572 = vmatmul.mubr.f32.vlgmr.msra.gmra.mrb[0].mxu1 %v28_v41  ;;  %436 = vmatprep.mubr.f32.mxu0 %v34_v42  ;;  %v205_v24 = vld [vmem:[%s2837_s0 + $0x250] sm:$0xff]  ;;  %v61_v28 = vld [vmem:[%s2838_s1 + $0x118] sm:$0xff]  ;;  %v63_v29 = vld [vmem:[%s2838_s1 + $0x128] sm:$0xff]  ;;  %v1837_v33 = vpack.c.bf16 %v224_v27, %v223_v26 }
  0x27   :  { %576 = vmatprep.mubr.f32.mxu1 %v36_v46  ;;  %1900 = vmatpush3.bf16.msra.mxu1 %v1815_v43  ;;  %v69_v30 = vld [vmem:[%s2838_s1 + $0x158] sm:$0xff]  ;;  %v1835_v31 = vpack.c.bf16 %v206_v25, %v205_v24  ;;  %v71_v32 = vld [vmem:[%s2838_s1 + $0x168] sm:$0xff]  ;;  %v207_v34 = vld [vmem:[%s2837_s0 + $0x260] sm:$0xff] }
  0x28   :  { %1816 = vmatpush3.bf16.msra.mxu0 %v1815_v43  ;;  %1893 = vmatprep.subr.bf16.mxu1 %v1817_v47  ;;  %v208_v35 = vld [vmem:[%s2837_s0 + $0x268] sm:$0xff]  ;;  %v225_v36 = vld [vmem:[%s2837_s0 + $0x2f0] sm:$0xff]  ;;  %v226_v37 = vld [vmem:[%s2837_s0 + $0x2f8] sm:$0xff] }
  0x29   :  { %437 = vmatmul.mubr.f32.gmra.mrb[2].mxu0 %v33_v50  ;;  %1818 = vmatprep.subr.bf16.mxu0 %v1817_v47  ;;  %v68_v38 = vld [vmem:[%s2838_s1 + $0x150] sm:$0xff]  ;;  %v70_v39 = vld [vmem:[%s2838_s1 + $0x160] sm:$0xff]  ;;  %v1839_v41 = vpack.c.bf16 %v208_v35, %v207_v34  ;;  %v1841_v43 = vpack.c.bf16 %v226_v37, %v225_v36  ;;  %v210_v45 = vld [vmem:[%s2837_s0 + $0x278] sm:$0xff] }
  0x2a   :  { %577 = vmatmul.mubr.f32.gmra.mrb[2].mxu1 %v35_v51  ;;  %441 = vmatprep.mubr.f32.mxu0 %v41_v52  ;;  %v76_v40 = vld [vmem:[%s2838_s1 + $0x190] sm:$0xff]  ;;  %v78_v42 = vld [vmem:[%s2838_s1 + $0x1a0] sm:$0xff]  ;;  %v75_v46 = vld [vmem:[%s2838_s1 + $0x188] sm:$0xff] }
  0x2b   :  { %581 = vmatprep.mubr.f32.mxu1 %v43_v56  ;;  %1901 = vmatpush3.bf16.msra.mxu1 %v1819_v53  ;;  %v209_v44 = vld [vmem:[%s2837_s0 + $0x270] sm:$0xff]  ;;  %v77_v47 = vld [vmem:[%s2838_s1 + $0x198] sm:$0xff]  ;;  %v83_v48 = vld [vmem:[%s2838_s1 + $0x1c8] sm:$0xff]  ;;  %v1915_v56 = vmov 0.0|0.0  }
  0x2c   :  { %1820 = vmatpush3.bf16.msra.mxu0 %v1819_v53  ;;  %1894 = vmatprep.subr.bf16.mxu1 %v1821_v57  ;;  %v1843_v49 = vpack.c.bf16 %v210_v45, %v209_v44  ;;  %v85_v50 = vld [vmem:[%s2838_s1 + $0x1d8] sm:$0xff]  ;;  %v82_v51 = vld [vmem:[%s2838_s1 + $0x1c0] sm:$0xff]  ;;  %v84_v53 = vld [vmem:[%s2838_s1 + $0x1d0] sm:$0xff] }
  0x2d   :  { %442 = vmatmul.mubr.f32.gmra.mrb[4].mxu0 %v40_v60  ;;  %1822 = vmatprep.subr.bf16.mxu0 %v1821_v57  ;;  %v231_v52 = vld [vmem:[%s2839_s2] sm:$0xff]  ;;  %v92_v55 = vld [vmem:[%s2838_s1 + $0x210] sm:$0xff]  ;;  %v89_v58 = vld [vmem:[%s2838_s1 + $0x1f8] sm:$0xff] }
  0x2e   :  { %582 = vmatmul.mubr.f32.gmra.mrb[4].mxu1 %v42_v63  ;;  %446 = vmatprep.mubr.f32.mxu0 %v48_v0  ;;  %v90_v54 = vld [vmem:[%s2838_s1 + $0x200] sm:$0xff]  ;;  %v233_v57 = vld [vmem:[%s2839_s2 + $0x10] sm:$0xff]  ;;  %v232_v59 = vld [vmem:[%s2839_s2 + $0x8] sm:$0xff] }
  0x2f   :  { %586 = vmatprep.mubr.f32.mxu1 %v50_v2  ;;  %1902 = vmatpush3.bf16.msra.mxu1 %v1823_v1  ;;  %v91_v60 = vld [vmem:[%s2838_s1 + $0x208] sm:$0xff]  ;;  %v97_v61 = vld [vmem:[%s2838_s1 + $0x238] sm:$0xff]  ;;  %v96_v0 = vld [vmem:[%s2838_s1 + $0x230] sm:$0xff] }
  0x30   :  { %1824 = vmatpush3.bf16.msra.mxu0 %v1823_v1  ;;  %1895 = vmatprep.subr.bf16.mxu1 %v1825_v3  ;;  %v99_v62 = vld [vmem:[%s2838_s1 + $0x248] sm:$0xff]  ;;  %v234_v63 = vld [vmem:[%s2839_s2 + $0x18] sm:$0xff]  ;;  %v235_v1 = vld [vmem:[%s2839_s2 + $0x20] sm:$0xff] }
  0x31   :  { %447 = vmatmul.mubr.f32.gmra.mrb[6].mxu0 %v47_v8  ;;  %1826 = vmatprep.subr.bf16.mxu0 %v1825_v3  ;;  %v98_v2 = vld [vmem:[%s2838_s1 + $0x240] sm:$0xff]  ;;  %v104_v3 = vld [vmem:[%s2838_s1 + $0x270] sm:$0xff]  ;;  %v236_v5 = vld [vmem:[%s2839_s2 + $0x28] sm:$0xff] }
  0x32   :  { %587 = vmatmul.mubr.f32.gmra.mrb[6].mxu1 %v49_v9  ;;  %451 = vmatprep.mubr.f32.mxu0 %v55_v10  ;;  %v106_v4 = vld [vmem:[%s2838_s1 + $0x280] sm:$0xff]  ;;  %v103_v6 = vld [vmem:[%s2838_s1 + $0x268] sm:$0xff]  ;;  %v237_v7 = vld [vmem:[%s2839_s2 + $0x30] sm:$0xff] }
  0x33   :  { %591 = vmatprep.mubr.f32.mxu1 %v57_v12  ;;  %1903 = vmatpush3.bf16.msra.mxu1 %v1827_v11  ;;  %v105_v8 = vld [vmem:[%s2838_s1 + $0x278] sm:$0xff]  ;;  %v111_v9 = vld [vmem:[%s2838_s1 + $0x2a8] sm:$0xff]  ;;  %v110_v12 = vld [vmem:[%s2838_s1 + $0x2a0] sm:$0xff] }
  0x34   :  { %1828 = vmatpush3.bf16.msra.mxu0 %v1827_v11  ;;  %1896 = vmatprep.subr.bf16.mxu1 %v1829_v13  ;;  %v113_v10 = vld [vmem:[%s2838_s1 + $0x2b8] sm:$0xff]  ;;  %v112_v14 = vld [vmem:[%s2838_s1 + $0x2b0] sm:$0xff]  ;;  %v118_v15 = vld [vmem:[%s2838_s1 + $0x2e0] sm:$0xff] }
  0x35   :  { %452 = vmatmul.mubr.f32.gmra.mrb[8].mxu0 %v54_v18  ;;  %1830 = vmatprep.subr.bf16.mxu0 %v1829_v13  ;;  %v238_v11 = vld [vmem:[%s2839_s2 + $0x38] sm:$0xff]  ;;  %v239_v13 = vld [vmem:[%s2839_s2 + $0x40] sm:$0xff]  ;;  %v120_v16 = vld [vmem:[%s2838_s1 + $0x2f0] sm:$0xff] }
  0x36   :  { %592 = vmatmul.mubr.f32.gmra.mrb[8].mxu1 %v56_v19  ;;  %456 = vmatprep.mubr.f32.mxu0 %v62_v20  ;;  %v240_v17 = vld [vmem:[%s2839_s2 + $0x48] sm:$0xff]  ;;  %v117_v18 = vld [vmem:[%s2838_s1 + $0x2d8] sm:$0xff]  ;;  %v241_v19 = vld [vmem:[%s2839_s2 + $0x50] sm:$0xff] }
  0x37   :  { %596 = vmatprep.mubr.f32.mxu1 %v64_v22  ;;  %1904 = vmatpush3.bf16.msra.mxu1 %v1831_v21  ;;  %v119_v20 = vld [vmem:[%s2838_s1 + $0x2e8] sm:$0xff]  ;;  %v124_v24 = vld [vmem:[%s2838_s1 + $0x310] sm:$0xff]  ;;  %v243_v25 = vld [vmem:[%s2839_s2 + $0x60] sm:$0xff] }
  0x38   :  { %1832 = vmatpush3.bf16.msra.mxu0 %v1831_v21  ;;  %1897 = vmatprep.subr.bf16.mxu1 %v1833_v23  ;;  %v125_v21 = vld [vmem:[%s2838_s1 + $0x318] sm:$0xff]  ;;  %v127_v22 = vld [vmem:[%s2838_s1 + $0x328] sm:$0xff]  ;;  %v126_v26 = vld [vmem:[%s2838_s1 + $0x320] sm:$0xff] }
  0x39   :  { %457 = vmatmul.mubr.f32.gmra.mrb[10].mxu0 %v61_v28  ;;  %1834 = vmatprep.subr.bf16.mxu0 %v1833_v23  ;;  %v242_v23 = vld [vmem:[%s2839_s2 + $0x58] sm:$0xff]  ;;  %v31_v27 = vld [vmem:[%s2838_s1 + $0x28] sm:$0xff]  ;;  %v100_v34 = vld [vmem:[%s2838_s1 + $0x250] sm:$0xff] }
  0x3a   :  { %597 = vmatmul.mubr.f32.gmra.mrb[10].mxu1 %v63_v29  ;;  %461 = vmatprep.mubr.f32.mxu0 %v69_v30  ;;  %v101_v28 = vld [vmem:[%s2838_s1 + $0x258] sm:$0xff]  ;;  %v227_v29 = vld [vmem:[%s2837_s0 + $0x300] sm:$0xff]  ;;  %v228_v30 = vld [vmem:[%s2837_s0 + $0x308] sm:$0xff] }
  0x3b   :  { %601 = vmatprep.mubr.f32.mxu1 %v71_v32  ;;  %1905 = vmatpush3.bf16.msra.mxu1 %v1835_v31  ;;  %v30_v32 = vld [vmem:[%s2838_s1 + $0x20] sm:$0xff]  ;;  %v1846_v36 = vpack.c.bf16 %v228_v30, %v227_v29  ;;  %v108_v37 = vld [vmem:[%s2838_s1 + $0x290] sm:$0xff]  ;;  %v45_v44 = vld [vmem:[%s2838_s1 + $0x98] sm:$0xff] }
  0x3c   :  { %1836 = vmatpush3.bf16.msra.mxu0 %v1835_v31  ;;  %1898 = vmatprep.subr.bf16.mxu1 %v1837_v33  ;;  %v244_v31 = vld [vmem:[%s2839_s2 + $0x68] sm:$0xff]  ;;  %v38_v35 = vld [vmem:[%s2838_s1 + $0x60] sm:$0xff] }
  0x3d   :  { %462 = vmatmul.mubr.f32.gmra.mrb[12].mxu0 %v68_v38  ;;  %1838 = vmatprep.subr.bf16.mxu0 %v1837_v33  ;;  %v245_v33 = vld [vmem:[%s2839_s2 + $0x70] sm:$0xff]  ;;  %v123_v29 = vld [vmem:[%s2838_s1 + $0x308] sm:$0xff]  ;;  %v130_v30 = vld [vmem:[%s2838_s1 + $0x340] sm:$0xff] }
  0x3e   :  { %602 = vmatmul.mubr.f32.gmra.mrb[12].mxu1 %v70_v39  ;;  %466 = vmatprep.mubr.f32.mxu0 %v76_v40  ;;  %v229_v38 = vld [vmem:[%s2837_s0 + $0x310] sm:$0xff]  ;;  %v230_v39 = vld [vmem:[%s2837_s0 + $0x318] sm:$0xff]  ;;  %v953_v40 = vld [vmem:[%s2840_s4] sm:$0xff] }
  0x3f   :  { %606 = vmatprep.mubr.f32.mxu1 %v78_v42  ;;  %1906 = vmatpush3.bf16.msra.mxu1 %v1839_v41  ;;  %v954_v42 = vld [vmem:[%s2840_s4 + $0x8] sm:$0xff]  ;;  %v1849_v45 = vpack.c.bf16 %v230_v39, %v229_v38 }
  0x40   :  { %1840 = vmatpush3.bf16.msra.mxu0 %v1839_v41  ;;  %1899 = vmatprep.subr.bf16.mxu1 %v1841_v43  ;;  %v37_v41 = vld [vmem:[%s2838_s1 + $0x58] sm:$0xff] }
  0x41   :  { %467 = vmatmul.mubr.f32.gmra.mrb[14].mxu0 %v75_v46  ;;  %1842 = vmatprep.subr.bf16.mxu0 %v1841_v43  ;;  %v107_v43 = vld [vmem:[%s2838_s1 + $0x288] sm:$0xff] }
  0x42   :  { %607 = vmatmul.mubr.f32.gmra.mrb[14].mxu1 %v77_v47  ;;  %471 = vmatprep.mubr.f32.mxu0 %v83_v48  ;;  %v115_v46 = vld [vmem:[%s2838_s1 + $0x2c8] sm:$0xff]  ;;  %v955_v47 = vld [vmem:[%s2840_s4 + $0x10] sm:$0xff] }
  0x43   :  { %611 = vmatprep.mubr.f32.mxu1 %v85_v50  ;;  %1907 = vmatpush3.bf16.msra.mxu1 %v1843_v49  ;;  %v44_v48 = vld [vmem:[%s2838_s1 + $0x90] sm:$0xff]  ;;  %v114_v50 = vld [vmem:[%s2838_s1 + $0x2c0] sm:$0xff] }
  0x44   :  { %1844 = vmatpush3.bf16.msra.mxu0 %v1843_v49  ;;  %1845 = vmatprep.subr.bf16.mxu1 %v1915_v56  ;;  %v956_v49 = vld [vmem:[%s2840_s4 + $0x18] sm:$0xff] }
  0x45   :  { %472 = vmatmul.mubr.f32.gmra.mrb[16].mxu0 %v82_v51  ;;  %248 = vperm.xlu0 %1912, %v231_v52   ;;  %v52_v51 = vld [vmem:[%s2838_s1 + $0xd0] sm:$0xff]  ;;  %v122_v52 = vld [vmem:[%s2838_s1 + $0x300] sm:$0xff] }
  0x46   :  { %612 = vmatmul.mubr.f32.gmra.mrb[16].mxu1 %v84_v53  ;;  %476 = vmatprep.mubr.f32.mxu0 %v90_v54  ;;  %v957_v53 = vld [vmem:[%s2840_s4 + $0x20] sm:$0xff]  ;;  %v51_v54 = vld [vmem:[%s2838_s1 + $0xc8] sm:$0xff] }
  0x47   :  { %616 = vmatprep.mubr.f32.mxu1 %v92_v55  ;;  %258 = vperm.xlu1 %1913, %v233_v57   ;;  %v958_v55 = vld [vmem:[%s2840_s4 + $0x28] sm:$0xff]  ;;  %v121_v57 = vld [vmem:[%s2838_s1 + $0x2f8] sm:$0xff] }
  0x48   :  { %1851 = vmatprep.subr.bf16.mxu0 %v1915_v56 }
  0x49   :  { %477 = vmatmul.mubr.f32.gmra.mrb[18].mxu0 %v89_v58  ;;  %253 = vperm.xlu0 %1912, %v232_v59   ;;  %v59_v58 = vld [vmem:[%s2838_s1 + $0x108] sm:$0xff]  ;;  %v129_v59 = vld [vmem:[%s2838_s1 + $0x338] sm:$0xff] }
  0x4a   :  { %617 = vmatmul.mubr.f32.gmra.mrb[18].mxu1 %v91_v60  ;;  %481 = vmatprep.mubr.f32.mxu0 %v97_v61  ;;  %v959_v60 = vld [vmem:[%s2840_s4 + $0x30] sm:$0xff]  ;;  %v58_v61 = vld [vmem:[%s2838_s1 + $0x100] sm:$0xff] }
  0x4b   :  { %621 = vmatprep.mubr.f32.mxu1 %v99_v62  ;;  %263 = vperm.xlu1 %1913, %v234_v63   ;;  %v960_v62 = vld [vmem:[%s2840_s4 + $0x38] sm:$0xff]  ;;  %v128_v63 = vld [vmem:[%s2838_s1 + $0x330] sm:$0xff] }
  0x4d   :  { %482 = vmatmul.mubr.f32.gmra.mrb[20].mxu0 %v96_v0  ;;  %268 = vperm.xlu0 %1912, %v235_v1   ;;  %v66_v0 = vld [vmem:[%s2838_s1 + $0x140] sm:$0xff] }
  0x4e   :  { %622 = vmatmul.mubr.f32.gmra.mrb[20].mxu1 %v98_v2  ;;  %486 = vmatprep.mubr.f32.mxu0 %v104_v3  ;;  %v961_v1 = vld [vmem:[%s2840_s4 + $0x40] sm:$0xff]  ;;  %v65_v2 = vld [vmem:[%s2838_s1 + $0x138] sm:$0xff]  ;;  %v962_v3 = vld [vmem:[%s2840_s4 + $0x48] sm:$0xff] }
  0x4f   :  { %626 = vmatprep.mubr.f32.mxu1 %v106_v4  ;;  %273 = vperm.xlu1 %1913, %v236_v5   ;;  %v1917_v4 = vmov 0.0   ;;  %v32_v5 = vld [vmem:[%s2838_s1 + $0x30] sm:$0xff] }
  0x51   :  { %487 = vmatmul.mubr.f32.gmra.mrb[22].mxu0 %v103_v6  ;;  %278 = vperm.xlu0 %1912, %v237_v7   ;;  %v73_v6 = vld [vmem:[%s2838_s1 + $0x178] sm:$0xff]  ;;  %v963_v7 = vld [vmem:[%s2840_s4 + $0x50] sm:$0xf] }
  0x52   :  { %627 = vmatmul.mubr.f32.gmra.mrb[22].mxu1 %v105_v8  ;;  %491 = vmatprep.mubr.f32.mxu0 %v111_v9  ;;  %v72_v8 = vld [vmem:[%s2838_s1 + $0x170] sm:$0xff]  ;;  %v1186_v9 = vld [vmem:[%s2841_s6] sm:$0xff] }
  0x53   :  { %631 = vmatprep.mubr.f32.mxu1 %v113_v10  ;;  %283 = vperm.xlu1 %1913, %v238_v11   ;;  %v39_v10 = vld [vmem:[%s2838_s1 + $0x68] sm:$0xff]  ;;  %v80_v11 = vld [vmem:[%s2838_s1 + $0x1b0] sm:$0xff] }
  0x55   :  { %492 = vmatmul.mubr.f32.gmra.mrb[24].mxu0 %v110_v12  ;;  %288 = vperm.xlu0 %1912, %v239_v13   ;;  %v1187_v12 = vld [vmem:[%s2841_s6 + $0x8] sm:$0x3] }
  0x56   :  { %632 = vmatmul.mubr.f32.gmra.mrb[24].mxu1 %v112_v14  ;;  %496 = vmatprep.mubr.f32.mxu0 %v118_v15  ;;  %v79_v13 = vld [vmem:[%s2838_s1 + $0x1a8] sm:$0xff]  ;;  %v46_v14 = vld [vmem:[%s2838_s1 + $0xa0] sm:$0xff] }
  0x57   :  { %636 = vmatprep.mubr.f32.mxu1 %v120_v16  ;;  %293 = vperm.xlu1 %1913, %v240_v17   ;;  %v87_v15 = vld [vmem:[%s2838_s1 + $0x1e8] sm:$0xff]  ;;  %v86_v16 = vld [vmem:[%s2838_s1 + $0x1e0] sm:$0xff]  ;;  %v53_v17 = vld [vmem:[%s2838_s1 + $0xd8] sm:$0xff] }
  0x59   :  { %497 = vmatmul.mubr.f32.gmra.mrb[26].mxu0 %v117_v18  ;;  %298 = vperm.xlu0 %1912, %v241_v19   ;;  %v94_v18 = vld [vmem:[%s2838_s1 + $0x220] sm:$0xff]  ;;  %v93_v19 = vld [vmem:[%s2838_s1 + $0x218] sm:$0xff] }
  0x5a   :  { %637 = vmatmul.mubr.f32.gmra.mrb[26].mxu1 %v119_v20  ;;  %501 = vmatprep.mubr.f32.mxu0 %v125_v21  ;;  %v60_v20 = vld [vmem:[%s2838_s1 + $0x110] sm:$0xff]  ;;  %v67_v21 = vld [vmem:[%s2838_s1 + $0x148] sm:$0xff] }
  0x5b   :  { %641 = vmatprep.mubr.f32.mxu1 %v127_v22  ;;  %303 = vperm.xlu1 %1913, %v242_v23   ;;  %v74_v22 = vld [vmem:[%s2838_s1 + $0x180] sm:$0xff]  ;;  %v81_v23 = vld [vmem:[%s2838_s1 + $0x1b8] sm:$0xff] }
  0x5d   :  { %502 = vmatmul.mubr.f32.gmra.mrb[28].mxu0 %v124_v24  ;;  %308 = vperm.xlu0 %1912, %v243_v25   ;;  %v88_v24 = vld [vmem:[%s2838_s1 + $0x1f0] sm:$0xff]  ;;  %v95_v25 = vld [vmem:[%s2838_s1 + $0x228] sm:$0xff] }
  0x5e   :  { %642 = vmatmul.mubr.f32.gmra.mrb[28].mxu1 %v126_v26  ;;  %711 = vmatprep.mubr.f32.mxu0 %v31_v27  ;;  %v102_v26 = vld [vmem:[%s2838_s1 + $0x260] sm:$0xff]  ;;  %v109_v27 = vld [vmem:[%s2838_s1 + $0x298] sm:$0xff] }
  0x5f   :  { %761 = vmatprep.mubr.f32.mxu1 %v101_v28  ;;  %313 = vperm.xlu1 %1913, %v244_v31   ;;  %v116_v28 = vld [vmem:[%s2838_s1 + $0x2d0] sm:$0xff] }
  0x61   :  { %712 = vmatmul.mubr.f32.vlgmr.msra.gmra.mrb[30].mxu0 %v30_v32  ;;  %318 = vperm.xlu0 %1912, %v245_v33  }
  0x62   :  { %762 = vmatmul.mubr.f32.vlgmr.msra.gmra.mrb[30].mxu1 %v100_v34  ;;  %716 = vmatprep.mubr.f32.mxu0 %v38_v35 }
  0x63   :  { %766 = vmatprep.mubr.f32.mxu1 %v108_v37  ;;  %1847 = vmatpush3.bf16.msra.mxu1 %v1846_v36 }
  0x64   :  { %1848 = vmatprep.subr.bf16.mxu1 %v1915_v56  ;;  %966 = vperm.xlu1 %1913, %v953_v40  }
  0x65   :  { %717 = vmatmul.mubr.f32.gmra.mrb[32].mxu0 %v37_v41  ;;  %971 = vperm.xlu0 %1912, %v954_v42  }
  0x66   :  { %767 = vmatmul.mubr.f32.gmra.mrb[32].mxu1 %v107_v43  ;;  %721 = vmatprep.mubr.f32.mxu0 %v45_v44 }
  0x67   :  { %771 = vmatprep.mubr.f32.mxu1 %v115_v46  ;;  %1850 = vmatpush3.bf16.msra.mxu1 %v1849_v45 }
  0x68   :  { %976 = vperm.xlu1 %1913, %v955_v47  }
  0x69   :  { %722 = vmatmul.mubr.f32.gmra.mrb[34].mxu0 %v44_v48  ;;  %981 = vperm.xlu0 %1912, %v956_v49  }
  0x6a   :  { %772 = vmatmul.mubr.f32.gmra.mrb[34].mxu1 %v114_v50  ;;  %726 = vmatprep.mubr.f32.mxu0 %v52_v51 }
  0x6b   :  { %776 = vmatprep.mubr.f32.mxu1 %v122_v52 }
  0x6c   :  { %986 = vperm.xlu1 %1913, %v957_v53  }
  0x6d   :  { %727 = vmatmul.mubr.f32.gmra.mrb[36].mxu0 %v51_v54  ;;  %991 = vperm.xlu0 %1912, %v958_v55  }
  0x6e   :  { %777 = vmatmul.mubr.f32.gmra.mrb[36].mxu1 %v121_v57  ;;  %731 = vmatprep.mubr.f32.mxu0 %v59_v58 }
  0x6f   :  { %781 = vmatprep.mubr.f32.mxu1 %v129_v59 }
  0x70   :  { %996 = vperm.xlu1 %1913, %v959_v60  }
  0x71   :  { %732 = vmatmul.mubr.f32.gmra.mrb[38].mxu0 %v58_v61  ;;  %1001 = vperm.xlu0 %1912, %v960_v62  }
  0x72   :  { %782 = vmatmul.mubr.f32.gmra.mrb[38].mxu1 %v128_v63  ;;  %736 = vmatprep.mubr.f32.mxu0 %v66_v0 }
  0x73   :  { %1616 = vmatprep.mubr.msk.f32.mxu1 %vm1916_vm0, %v1917_v4 }
  0x74   :  { %1006 = vperm.xlu1 %1913, %v961_v1  }
  0x75   :  { %737 = vmatmul.mubr.f32.gmra.mrb[40].mxu0 %v65_v2  ;;  %1011 = vperm.xlu0 %1912, %v962_v3  }
  0x76   :  { %1617 = vmatmul.mubr.msk.f32.vlgmr.msra.gmra.mrb[40].mxu1 %vm321_vm1, %v32_v5  ;;  %741 = vmatprep.mubr.f32.mxu0 %v73_v6 }
  0x77   :  { %1619 = vmatprep.mubr.msk.f32.mxu1 %vm1916_vm0, %v1917_v4 }
  0x78   :  { %1016 = vperm.xlu1 %1913, %v963_v7  }
  0x79   :  { %742 = vmatmul.mubr.f32.gmra.mrb[42].mxu0 %v72_v8  ;;  %1190 = vperm.xlu0 %1912, %v1186_v9  }
  0x7a   :  { %1620 = vmatmul.mubr.msk.f32.gmra.mrb[42].mxu1 %vm321_vm1, %v39_v10  ;;  %746 = vmatprep.mubr.f32.mxu0 %v80_v11 }
  0x7b   :  { %1622 = vmatprep.mubr.msk.f32.mxu1 %vm1916_vm0, %v1917_v4 }
  0x7c   :  { %1195 = vperm.xlu1 %1913, %v1187_v12  }
  0x7d   :  { %747 = vmatmul.mubr.f32.gmra.mrb[44].mxu0 %v79_v13 }
  0x7e   :  { %1623 = vmatmul.mubr.msk.f32.gmra.mrb[44].mxu1 %vm321_vm1, %v46_v14  ;;  %751 = vmatprep.mubr.f32.mxu0 %v87_v15 }
  0x7f   :  { %1625 = vmatprep.mubr.msk.f32.mxu1 %vm1916_vm0, %v1917_v4 }
  0x81   :  { %752 = vmatmul.mubr.f32.gmra.mrb[46].mxu0 %v86_v16 }
  0x82   :  { %1626 = vmatmul.mubr.msk.f32.gmra.mrb[46].mxu1 %vm321_vm1, %v53_v17  ;;  %756 = vmatprep.mubr.f32.mxu0 %v94_v18 }
  0x83   :  { %1628 = vmatprep.mubr.msk.f32.mxu1 %vm1916_vm0, %v1917_v4 }
  0x85   :  { %757 = vmatmul.mubr.f32.gmra.mrb[48].mxu0 %v93_v19 }
  0x86   :  { %1629 = vmatmul.mubr.msk.f32.gmra.mrb[48].mxu1 %vm321_vm1, %v60_v20  ;;  %1691 = vmatprep.mubr.msk.f32.mxu0 %vm1916_vm0, %v1917_v4 }
  0x87   :  { %1631 = vmatprep.mubr.msk.f32.mxu1 %vm1916_vm0, %v1917_v4 }
  0x8a   :  { %1632 = vmatmul.mubr.msk.f32.gmra.mrb[50].mxu1 %vm321_vm1, %v67_v21 }
  0x8b   :  { %1634 = vmatprep.mubr.msk.f32.mxu1 %vm1916_vm0, %v1917_v4 }
  0x8e   :  { %1635 = vmatmul.mubr.msk.f32.gmra.mrb[52].mxu1 %vm321_vm1, %v74_v22 }
  0x8f   :  { %1637 = vmatprep.mubr.msk.f32.mxu1 %vm1916_vm0, %v1917_v4 }
  0x92   :  { %1638 = vmatmul.mubr.msk.f32.gmra.mrb[54].mxu1 %vm321_vm1, %v81_v23 }
  0x93   :  { %1640 = vmatprep.mubr.msk.f32.mxu1 %vm1916_vm0, %v1917_v4 }
  0x96   :  { %1641 = vmatmul.mubr.msk.f32.gmra.mrb[56].mxu1 %vm321_vm1, %v88_v24 }
  0x97   :  { %1643 = vmatprep.mubr.msk.f32.mxu1 %vm1916_vm0, %v1917_v4 }
  0x9a   :  { %1644 = vmatmul.mubr.msk.f32.gmra.mrb[58].mxu1 %vm321_vm1, %v95_v25 }
  0x9b   :  { %1646 = vmatprep.mubr.msk.f32.mxu1 %vm1916_vm0, %v1917_v4 }
  0x9e   :  { %1647 = vmatmul.mubr.msk.f32.gmra.mrb[60].mxu1 %vm321_vm1, %v102_v26 }
  0x9f   :  { %1649 = vmatprep.mubr.msk.f32.mxu1 %vm1916_vm0, %v1917_v4 }
  0xa2   :  { %1650 = vmatmul.mubr.msk.f32.gmra.mrb[62].mxu1 %vm321_vm1, %v109_v27 }
  0xa3   :  { %1652 = vmatprep.mubr.msk.f32.mxu1 %vm1916_vm0, %v1917_v4 }
  0xa6   :  { %1653 = vmatmul.mubr.msk.f32.gmra.mrb[64].mxu1 %vm321_vm1, %v116_v28 }
  0xa7   :  { %1655 = vmatprep.mubr.msk.f32.mxu1 %vm1916_vm0, %v1917_v4 }
  0xaa   :  { %1656 = vmatmul.mubr.msk.f32.gmra.mrb[66].mxu1 %vm321_vm1, %v123_v29 }
  0xab   :  { %1658 = vmatprep.mubr.msk.f32.mxu1 %vm1916_vm0, %v1917_v4 }
  0xae   :  { %1659 = vmatmul.mubr.msk.f32.gmra.mrb[68].mxu1 %vm321_vm1, %v130_v30 }
  0xc4   :  { %v249_v31 = vpop.permute.xlu0 %248 }
  0xc6   :  { %v259_v46 = vpop.permute.xlu1 %258 }
  0xc8   :  { %v254_v40 = vpop.permute.xlu0 %253 }
  0xca   :  { %v264_v59 = vpop.permute.xlu1 %263 }
  0xcc   :  { %v269_v5 = vpop.permute.xlu0 %268 }
  0xce   :  { %v274_v14 = vpop.permute.xlu1 %273 }
  0xd0   :  { %v279_v23 = vpop.permute.xlu0 %278 }
  0xf8   :  { %v1351_v32 = vpop.f32.mrb[0].mxu0 }
  0xf9   :  { %v1428_v33 = vpop.f32.mrb[0].mxu1  ;;  %v1352_v34 = vpop.f32.mrb[1].mxu0 }
  0xfa   :  { %v1353_v35 = vadd.f32 %v1352_v34, %v1351_v32  ;;  %v1429_v36 = vpop.f32.mrb[1].mxu1  ;;  %v284_v32 = vpop.permute.xlu1 %283 }
  0xfb   :  { %v1430_v37 = vadd.f32 %v1429_v36, %v1428_v33 }
  0xfc   :  { %v434_v38 = vadd.f32 %v1353_v35, %v249_v31  ;;  %v1354_v39 = vpop.f32.mrb[2].mxu0 }
  0xfd   :  { %v1431_v41 = vpop.f32.mrb[2].mxu1  ;;  %v1355_v42 = vpop.f32.mrb[3].mxu0 }
  0xfe   :  { %v2707_v43 = vadd.f32 %v1430_v37, %v434_v38  ;;  %v1356_v44 = vadd.f32 %v1355_v42, %v1354_v39  ;;  %v1432_v45 = vpop.f32.mrb[3].mxu1 }
  0xff   :  { %v1433_v47 = vadd.f32 %v1432_v45, %v1431_v41  ;;  %v289_v41 = vpop.permute.xlu0 %288 }
 0x100   :  { %v439_v48 = vadd.f32 %v1356_v44, %v254_v40  ;;  %v1357_v49 = vpop.f32.mrb[4].mxu0 }
 0x101   :  { %v1434_v50 = vpop.f32.mrb[4].mxu1  ;;  %v1358_v51 = vpop.f32.mrb[5].mxu0 }
 0x102   :  { %v2709_v52 = vadd.f32 %v1433_v47, %v439_v48  ;;  %v1359_v53 = vadd.f32 %v1358_v51, %v1357_v49  ;;  %v1435_v54 = vpop.f32.mrb[5].mxu1  ;;  %v294_v51 = vpop.permute.xlu1 %293 }
 0x103   :  { %v1436_v55 = vadd.f32 %v1435_v54, %v1434_v50 }
 0x104   :  { %v444_v57 = vadd.f32 %v1359_v53, %v259_v46  ;;  %v1360_v58 = vpop.f32.mrb[6].mxu0 }
 0x105   :  { %v1437_v60 = vpop.f32.mrb[6].mxu1  ;;  %v1361_v61 = vpop.f32.mrb[7].mxu0 }
 0x106   :  { %v2711_v62 = vadd.f32 %v1436_v55, %v444_v57  ;;  %v1362_v63 = vadd.f32 %v1361_v61, %v1360_v58  ;;  %v1438_v0 = vpop.f32.mrb[7].mxu1 }
 0x107   :  { %v1439_v1 = vadd.f32 %v1438_v0, %v1437_v60 }
 0x108   :  { %v449_v2 = vadd.f32 %v1362_v63, %v264_v59  ;;  %v1363_v3 = vpop.f32.mrb[8].mxu0  ;;  %v299_v63 = vpop.permute.xlu0 %298 }
 0x109   :  { %v1440_v6 = vpop.f32.mrb[8].mxu1  ;;  %v1364_v7 = vpop.f32.mrb[9].mxu0 }
 0x10a   :  { %v2713_v8 = vadd.f32 %v1439_v1, %v449_v2  ;;  %v1365_v9 = vadd.f32 %v1364_v7, %v1363_v3  ;;  %v1441_v10 = vpop.f32.mrb[9].mxu1 }
 0x10b   :  { %v1442_v11 = vadd.f32 %v1441_v10, %v1440_v6  ;;  %v304_v10 = vpop.permute.xlu1 %303 }
 0x10c   :  { %v454_v12 = vadd.f32 %v1365_v9, %v269_v5  ;;  %v1366_v13 = vpop.f32.mrb[10].mxu0 }
 0x10d   :  { %v1443_v15 = vpop.f32.mrb[10].mxu1  ;;  %v1367_v16 = vpop.f32.mrb[11].mxu0 }
 0x10e   :  { %v2715_v17 = vadd.f32 %v1442_v11, %v454_v12  ;;  %v1368_v18 = vadd.f32 %v1367_v16, %v1366_v13  ;;  %v1444_v19 = vpop.f32.mrb[11].mxu1 }
 0x10f   :  { %v1445_v20 = vadd.f32 %v1444_v19, %v1443_v15 }
 0x110   :  { %v459_v21 = vadd.f32 %v1368_v18, %v274_v14  ;;  %v1369_v22 = vpop.f32.mrb[12].mxu0 }
 0x111   :  { %v1446_v24 = vpop.f32.mrb[12].mxu1  ;;  %v1370_v25 = vpop.f32.mrb[13].mxu0 }
 0x112   :  { %v2717_v26 = vadd.f32 %v1445_v20, %v459_v21  ;;  %v1371_v27 = vadd.f32 %v1370_v25, %v1369_v22  ;;  %v1447_v28 = vpop.f32.mrb[13].mxu1  ;;  %v309_v20 = vpop.permute.xlu0 %308 }
 0x113   :  { %v1448_v29 = vadd.f32 %v1447_v28, %v1446_v24 }
 0x114   :  { %v464_v30 = vadd.f32 %v1371_v27, %v279_v23  ;;  %v1372_v31 = vpop.f32.mrb[14].mxu0 }
 0x115   :  { %v1449_v33 = vpop.f32.mrb[14].mxu1  ;;  %v1373_v34 = vpop.f32.mrb[15].mxu0 }
 0x116   :  { %v2719_v35 = vadd.f32 %v1448_v29, %v464_v30  ;;  %v1374_v36 = vadd.f32 %v1373_v34, %v1372_v31  ;;  %v1450_v37 = vpop.f32.mrb[15].mxu1  ;;  %v314_v30 = vpop.permute.xlu1 %313 }
 0x117   :  { %v1451_v38 = vadd.f32 %v1450_v37, %v1449_v33 }
 0x118   :  { %v469_v39 = vadd.f32 %v1374_v36, %v284_v32  ;;  %v1375_v40 = vpop.f32.mrb[16].mxu0 }
 0x119   :  { %v1452_v42 = vpop.f32.mrb[16].mxu1  ;;  %v1376_v44 = vpop.f32.mrb[17].mxu0 }
 0x11a   :  { %v2721_v45 = vadd.f32 %v1451_v38, %v469_v39  ;;  %v1377_v46 = vadd.f32 %v1376_v44, %v1375_v40  ;;  %v1453_v47 = vpop.f32.mrb[17].mxu1  ;;  %v319_v40 = vpop.permute.xlu0 %318 }
 0x11b   :  { %v1454_v48 = vadd.f32 %v1453_v47, %v1452_v42 }
 0x11c   :  { %v474_v49 = vadd.f32 %v1377_v46, %v289_v41  ;;  %v1378_v50 = vpop.f32.mrb[18].mxu0 }
 0x11d   :  { %v1455_v53 = vpop.f32.mrb[18].mxu1  ;;  %v1379_v54 = vpop.f32.mrb[19].mxu0 }
 0x11e   :  { %v2723_v55 = vadd.f32 %v1454_v48, %v474_v49  ;;  %v1380_v57 = vadd.f32 %v1379_v54, %v1378_v50  ;;  %v1456_v58 = vpop.f32.mrb[19].mxu1 }
 0x11f   :  { %v1457_v59 = vadd.f32 %v1456_v58, %v1455_v53 }
 0x120   :  { %v479_v60 = vadd.f32 %v1380_v57, %v294_v51  ;;  %v1381_v61 = vpop.f32.mrb[20].mxu0 }
 0x121   :  { %v1458_v0 = vpop.f32.mrb[20].mxu1  ;;  %v1382_v1 = vpop.f32.mrb[21].mxu0 }
 0x122   :  { %v2725_v2 = vadd.f32 %v1457_v59, %v479_v60  ;;  %v1383_v3 = vadd.f32 %v1382_v1, %v1381_v61  ;;  %v1459_v5 = vpop.f32.mrb[21].mxu1 }
 0x123   :  { %v1460_v6 = vadd.f32 %v1459_v5, %v1458_v0 }
 0x124   :  { %v484_v7 = vadd.f32 %v1383_v3, %v299_v63  ;;  %v1384_v9 = vpop.f32.mrb[22].mxu0 }
 0x125   :  { %v1461_v11 = vpop.f32.mrb[22].mxu1  ;;  %v1385_v12 = vpop.f32.mrb[23].mxu0 }
 0x126   :  { %v624_v13 = vadd.f32 %v1460_v6, %v484_v7  ;;  %v1386_v14 = vadd.f32 %v1385_v12, %v1384_v9  ;;  %v1462_v15 = vpop.f32.mrb[23].mxu1 }
 0x127   :  { %v1463_v16 = vadd.f32 %v1462_v15, %v1461_v11 }
 0x128   :  { %v489_v18 = vadd.f32 %v1386_v14, %v304_v10  ;;  %v1387_v19 = vpop.f32.mrb[24].mxu0 }
 0x129   :  { %v1464_v21 = vpop.f32.mrb[24].mxu1  ;;  %v1388_v22 = vpop.f32.mrb[25].mxu0 }
 0x12a   :  { %v629_v23 = vadd.f32 %v1463_v16, %v489_v18  ;;  %v1389_v24 = vadd.f32 %v1388_v22, %v1387_v19  ;;  %v1465_v25 = vpop.f32.mrb[25].mxu1 }
 0x12b   :  { %v1466_v27 = vadd.f32 %v1465_v25, %v1464_v21 }
 0x12c   :  { %v494_v28 = vadd.f32 %v1389_v24, %v309_v20  ;;  %v1390_v29 = vpop.f32.mrb[26].mxu0 }
 0x12d   :  { %v1467_v31 = vpop.f32.mrb[26].mxu1  ;;  %v1391_v32 = vpop.f32.mrb[27].mxu0 }
 0x12e   :  { %v634_v33 = vadd.f32 %v1466_v27, %v494_v28  ;;  %v1392_v34 = vadd.f32 %v1391_v32, %v1390_v29  ;;  %v1468_v36 = vpop.f32.mrb[27].mxu1 }
 0x12f   :  { %v1469_v37 = vadd.f32 %v1468_v36, %v1467_v31 }
 0x130   :  { %v499_v38 = vadd.f32 %v1392_v34, %v314_v30  ;;  %v1393_v39 = vpop.f32.mrb[28].mxu0 }
 0x131   :  { %v1470_v41 = vpop.f32.mrb[28].mxu1  ;;  %v1394_v42 = vpop.f32.mrb[29].mxu0 }
 0x132   :  { %v639_v44 = vadd.f32 %v1469_v37, %v499_v38  ;;  %v1395_v46 = vadd.f32 %v1394_v42, %v1393_v39  ;;  %v1471_v47 = vpop.f32.mrb[29].mxu1 }
 0x133   :  { %v1472_v48 = vadd.f32 %v1471_v47, %v1470_v41 }
 0x134   :  { %v504_v49 = vadd.f32 %v1395_v46, %v319_v40  ;;  %v1505_v50 = vpop.f32.mrb[30].mxu0 }
 0x135   :  { %v1535_v51 = vpop.f32.mrb[30].mxu1  ;;  %v1506_v53 = vpop.f32.mrb[31].mxu0 }
 0x136   :  { %v644_v54 = vadd.f32 %v1472_v48, %v504_v49  ;;  %v1507_v57 = vadd.f32 %v1506_v53, %v1505_v50  ;;  %v1536_v58 = vpop.f32.mrb[31].mxu1 }
 0x137   :  { %v1537_v59 = vadd.f32 %v1536_v58, %v1535_v51 }
 0x138   :  { %v1508_v60 = vpop.f32.mrb[32].mxu0  ;;  %v714_v61 = vadd.f32 %v1507_v57, %v2707_v43 }
 0x139   :  { %v1538_v63 = vpop.f32.mrb[32].mxu1  ;;  %v1509_v0 = vpop.f32.mrb[33].mxu0  ;;  %v2728_v1 = vadd.f32 %v1537_v59, %v624_v13 }
 0x13a   :  { %v1510_v3 = vadd.f32 %v1509_v0, %v1508_v60  ;;  %v1539_v5 = vpop.f32.mrb[33].mxu1 }
 0x13b   :  { %v1540_v6 = vadd.f32 %v1539_v5, %v1538_v63 }
 0x13c   :  { %v1511_v7 = vpop.f32.mrb[34].mxu0  ;;  %v719_v9 = vadd.f32 %v1510_v3, %v2709_v52 }
 0x13d   :  { %v1541_v10 = vpop.f32.mrb[34].mxu1  ;;  %v1512_v11 = vpop.f32.mrb[35].mxu0  ;;  %v2731_v12 = vadd.f32 %v1540_v6, %v629_v23 }
 0x13e   :  { %v1513_v14 = vadd.f32 %v1512_v11, %v1511_v7  ;;  %v1542_v15 = vpop.f32.mrb[35].mxu1 }
 0x13f   :  { %v1543_v16 = vadd.f32 %v1542_v15, %v1541_v10 }
 0x140   :  { %v1514_v18 = vpop.f32.mrb[36].mxu0  ;;  %v724_v43 = vadd.f32 %v1513_v14, %v2711_v62 }
 0x141   :  { %v1544_v19 = vpop.f32.mrb[36].mxu1  ;;  %v1515_v20 = vpop.f32.mrb[37].mxu0  ;;  %v2734_v13 = vadd.f32 %v1543_v16, %v634_v33 }
 0x142   :  { %v1516_v21 = vadd.f32 %v1515_v20, %v1514_v18  ;;  %v1545_v22 = vpop.f32.mrb[37].mxu1 }
 0x143   :  { %v1546_v24 = vadd.f32 %v1545_v22, %v1544_v19 }
 0x144   :  { %v1517_v25 = vpop.f32.mrb[38].mxu0  ;;  %v729_v52 = vadd.f32 %v1516_v21, %v2713_v8 }
 0x145   :  { %v1547_v27 = vpop.f32.mrb[38].mxu1  ;;  %v1518_v28 = vpop.f32.mrb[39].mxu0  ;;  %v2737_v23 = vadd.f32 %v1546_v24, %v639_v44 }
 0x146   :  { %v1519_v29 = vadd.f32 %v1518_v28, %v1517_v25  ;;  %v1548_v30 = vpop.f32.mrb[39].mxu1 }
 0x147   :  { %v1549_v31 = vadd.f32 %v1548_v30, %v1547_v27 }
 0x148   :  { %v1520_v32 = vpop.f32.mrb[40].mxu0  ;;  %v734_v62 = vadd.f32 %v1519_v29, %v2715_v17 }
 0x149   :  { %v853_v34 = vpop.f32.mrb[40].mxu1  ;;  %v1521_v36 = vpop.f32.mrb[41].mxu0  ;;  %v2740_v33 = vadd.f32 %v1549_v31, %v644_v54 }
 0x14a   :  { %v854_v37 = vadd.f32 %v853_v34, %v714_v61  ;;  %v1522_v38 = vadd.f32 %v1521_v36, %v1520_v32  ;;  %v1618_v39 = vpop.f32.mrb[41].mxu1 }
 0x14c   :  { %v1523_v40 = vpop.f32.mrb[42].mxu0  ;;  %v739_v8 = vadd.f32 %v1522_v38, %v2717_v26  ;;  %v927_v48 = vmax.f32 %v854_v37, 0.0 }
 0x14d   :  { %v858_v41 = vpop.f32.mrb[42].mxu1  ;;  %v1524_v42 = vpop.f32.mrb[43].mxu0 }
 0x14e   :  { %v859_v44 = vadd.f32 %v858_v41, %v719_v9  ;;  %v1525_v46 = vadd.f32 %v1524_v42, %v1523_v40  ;;  %v1621_v47 = vpop.f32.mrb[43].mxu1 }
 0x150   :  { %v928_v49 = vmax.f32 %v859_v44, 0.0  ;;  %v1526_v50 = vpop.f32.mrb[44].mxu0  ;;  %v744_v17 = vadd.f32 %v1525_v46, %v2719_v35 }
 0x151   :  { %v863_v51 = vpop.f32.mrb[44].mxu1  ;;  %v1527_v53 = vpop.f32.mrb[45].mxu0 }
 0x152   :  { %v1852_v54 = vpack.c.bf16 %v928_v49, %v927_v48  ;;  %v864_v57 = vadd.f32 %v863_v51, %v724_v43  ;;  %v1528_v58 = vadd.f32 %v1527_v53, %v1526_v50  ;;  %v1624_v59 = vpop.f32.mrb[45].mxu1 }
 0x154   :  { %1853 = vmatpush3.bf16.msra.mxu0 %v1852_v54  ;;  %v1529_v60 = vpop.f32.mrb[46].mxu0  ;;  %v749_v26 = vadd.f32 %v1528_v58, %v2721_v45  ;;  %v929_v6 = vmax.f32 %v864_v57, 0.0 }
 0x155   :  { %v868_v61 = vpop.f32.mrb[46].mxu1  ;;  %v1530_v63 = vpop.f32.mrb[47].mxu0  ;;  %1854 = vmatprep.subr.bf16.mxu0 %v1915_v56 }
 0x156   :  { %v869_v0 = vadd.f32 %v868_v61, %v729_v52  ;;  %v1531_v3 = vadd.f32 %v1530_v63, %v1529_v60  ;;  %v1627_v5 = vpop.f32.mrb[47].mxu1 }
 0x157   :  { %v947_v5 = vld [vmem:[%s2842_s3 + $0x28] sm:$0xff] }
 0x158   :  { %v930_v7 = vmax.f32 %v869_v0, 0.0  ;;  %v1532_v35 = vpop.f32.mrb[48].mxu0  ;;  %v754_v9 = vadd.f32 %v1531_v3, %v2723_v55  ;;  %v946_v3 = vld [vmem:[%s2842_s3 + $0x20] sm:$0xff] }
 0x159   :  { %v873_v10 = vpop.f32.mrb[48].mxu1  ;;  %v1533_v11 = vpop.f32.mrb[49].mxu0 }
 0x15a   :  { %v1855_v14 = vpack.c.bf16 %v930_v7, %v929_v6  ;;  %v874_v15 = vadd.f32 %v873_v10, %v734_v62  ;;  %v1534_v16 = vadd.f32 %v1533_v11, %v1532_v35  ;;  %v1630_v18 = vpop.f32.mrb[49].mxu1  ;;  %v948_v6 = vld [vmem:[%s2842_s3 + $0x30] sm:$0xff]  ;;  %v949_v7 = vld [vmem:[%s2842_s3 + $0x38] sm:$0xff]  ;;  %v950_v35 = vld [vmem:[%s2842_s3 + $0x40] sm:$0xff] }
 0x15b   :  { %v952_v10 = vld [vmem:[%s2842_s3 + $0x50] sm:$0xf]  ;;  %v1184_v11 = vld [vmem:[%s2843_s5] sm:$0xff] }
 0x15c   :  { %1856 = vmatpush3.bf16.msra.mxu0 %v1855_v14  ;;  %v759_v45 = vadd.f32 %v1534_v16, %v2725_v2  ;;  %v931_v21 = vmax.f32 %v874_v15, 0.0  ;;  %1746 = vmatprep.mubr.msk.f32.mxu1 %vm1198_vm3, %v1184_v11  ;;  %v967_v16 = vpop.permute.xlu1 %966 }
 0x15d   :  { %v878_v43 = vpop.f32.mrb[50].mxu1  ;;  %1857 = vmatprep.subr.bf16.mxu0 %v1915_v56 }
 0x15e   :  { %v879_v19 = vadd.f32 %v878_v43, %v739_v8  ;;  %v1633_v20 = vpop.f32.mrb[51].mxu1 }
 0x160   :  { %v932_v22 = vmax.f32 %v879_v19, 0.0 }
 0x161   :  { %v883_v24 = vpop.f32.mrb[52].mxu1 }
 0x162   :  { %v1858_v25 = vpack.c.bf16 %v932_v22, %v931_v21  ;;  %v884_v52 = vadd.f32 %v883_v24, %v744_v17  ;;  %v1636_v55 = vpop.f32.mrb[53].mxu1 }
 0x164   :  { %1859 = vmatpush3.bf16.msra.mxu0 %v1858_v25  ;;  %v933_v30 = vmax.f32 %v884_v52, 0.0  ;;  %v977_v52 = vpop.permute.xlu1 %976 }
 0x165   :  { %v888_v27 = vpop.f32.mrb[54].mxu1  ;;  %1860 = vmatprep.subr.bf16.mxu0 %v1915_v56 }
 0x166   :  { %v889_v28 = vadd.f32 %v888_v27, %v749_v26  ;;  %v1639_v29 = vpop.f32.mrb[55].mxu1 }
 0x168   :  { %v934_v31 = vmax.f32 %v889_v28, 0.0 }
 0x169   :  { %v893_v2 = vpop.f32.mrb[56].mxu1 }
 0x16a   :  { %v1861_v32 = vpack.c.bf16 %v934_v31, %v933_v30  ;;  %v894_v62 = vadd.f32 %v893_v2, %v754_v9  ;;  %v1642_v34 = vpop.f32.mrb[57].mxu1  ;;  %v951_v9 = vld [vmem:[%s2842_s3 + $0x48] sm:$0xff] }
 0x16c   :  { %1862 = vmatpush3.bf16.msra.mxu0 %v1861_v32  ;;  %v935_v39 = vmax.f32 %v894_v62, 0.0 }
 0x16d   :  { %v898_v36 = vpop.f32.mrb[58].mxu1  ;;  %1863 = vmatprep.subr.bf16.mxu0 %v1915_v56 }
 0x16e   :  { %v899_v37 = vadd.f32 %v898_v36, %v759_v45  ;;  %v1645_v38 = vpop.f32.mrb[59].mxu1  ;;  %v972_v45 = vpop.permute.xlu0 %971 }
 0x16f   :  { %v987_v36 = vpop.permute.xlu1 %986 }
 0x170   :  { %v936_v40 = vmax.f32 %v899_v37, 0.0 }
 0x171   :  { %v903_v8 = vpop.f32.mrb[60].mxu1 }
 0x172   :  { %v1864_v41 = vpack.c.bf16 %v936_v40, %v935_v39  ;;  %v904_v42 = vadd.f32 %v903_v8, %v2728_v1  ;;  %v1648_v44 = vpop.f32.mrb[61].mxu1  ;;  %v982_v27 = vpop.permute.xlu0 %981 }
 0x174   :  { %1865 = vmatpush3.bf16.msra.mxu0 %v1864_v41  ;;  %v937_v49 = vmax.f32 %v904_v42, 0.0 }
 0x175   :  { %v908_v46 = vpop.f32.mrb[62].mxu1  ;;  %1866 = vmatprep.subr.bf16.mxu0 %v1915_v56 }
 0x176   :  { %v909_v47 = vadd.f32 %v908_v46, %v2731_v12  ;;  %v1651_v48 = vpop.f32.mrb[63].mxu1  ;;  %v992_v38 = vpop.permute.xlu0 %991 }
 0x177   :  { %v997_v48 = vpop.permute.xlu1 %996 }
 0x178   :  { %v938_v50 = vmax.f32 %v909_v47, 0.0 }
 0x179   :  { %v913_v17 = vpop.f32.mrb[64].mxu1 }
 0x17a   :  { %v1867_v51 = vpack.c.bf16 %v938_v50, %v937_v49  ;;  %v914_v53 = vadd.f32 %v913_v17, %v2734_v13  ;;  %v1654_v54 = vpop.f32.mrb[65].mxu1  ;;  %v942_v13 = vld [vmem:[%s2842_s3] sm:$0xff]  ;;  %v1002_v50 = vpop.permute.xlu0 %1001 }
 0x17c   :  { %1868 = vmatpush3.bf16.msra.mxu0 %v1867_v51  ;;  %v939_v59 = vmax.f32 %v914_v53, 0.0 }
 0x17d   :  { %v918_v57 = vpop.f32.mrb[66].mxu1  ;;  %1869 = vmatprep.subr.bf16.mxu0 %v1915_v56  ;;  %v943_v56 = vld [vmem:[%s2842_s3 + $0x8] sm:$0xff] }
 0x17e   :  { %v919_v1 = vadd.f32 %v918_v57, %v2737_v23  ;;  %v1657_v58 = vpop.f32.mrb[67].mxu1  ;;  %v944_v23 = vld [vmem:[%s2842_s3 + $0x10] sm:$0xff] }
 0x180   :  { %v940_v60 = vmax.f32 %v919_v1, 0.0 }
 0x181   :  { %v923_v26 = vpop.f32.mrb[68].mxu1 }
 0x182   :  { %v1870_v61 = vpack.c.bf16 %v940_v60, %v939_v59  ;;  %v924_v12 = vadd.f32 %v923_v26, %v2740_v33  ;;  %v1660_v63 = vpop.f32.mrb[69].mxu1  ;;  %v945_v33 = vld [vmem:[%s2842_s3 + $0x18] sm:$0xff]  ;;  %v1007_v60 = vpop.permute.xlu1 %1006 }
 0x184   :  { %1871 = vmatpush3.bf16.msra.mxu0 %v1870_v61  ;;  %v941_v0 = vmax.f32 %v924_v12, 0.0  ;;  %v1012_v61 = vpop.permute.xlu0 %1011 }
 0x185   :  { %1689 = vmatprep.subr.mxu0 %v1917_v4 }
 0x188   :  { %1690 = vmatpush3.msra.mxu0 %v941_v0  ;;  %v1191_v11 = vpop.permute.xlu0 %1190 }
 0x189   :  { %1692 = vmatmul.mubr.msk.f32.vlgmr.msra.gmra.mrb[50].mxu0 %vm1019_vm2, %v942_v13 }
 0x18a   :  { %1694 = vmatprep.mubr.msk.f32.mxu0 %vm1916_vm0, %v1917_v4 }
 0x18d   :  { %1695 = vmatmul.mubr.msk.f32.gmra.mrb[52].mxu0 %vm1019_vm2, %v943_v56 }
 0x18e   :  { %1697 = vmatprep.mubr.msk.f32.mxu0 %vm1916_vm0, %v1917_v4 }
 0x191   :  { %1698 = vmatmul.mubr.msk.f32.gmra.mrb[54].mxu0 %vm1019_vm2, %v944_v23  ;;  %v1017_v23 = vpop.permute.xlu1 %1016 }
 0x192   :  { %1700 = vmatprep.mubr.msk.f32.mxu0 %vm1916_vm0, %v1917_v4 }
 0x195   :  { %1701 = vmatmul.mubr.msk.f32.gmra.mrb[56].mxu0 %vm1019_vm2, %v945_v33 }
 0x196   :  { %1703 = vmatprep.mubr.msk.f32.mxu0 %vm1916_vm0, %v1917_v4 }
 0x199   :  { %1704 = vmatmul.mubr.msk.f32.gmra.mrb[58].mxu0 %vm1019_vm2, %v946_v3 }
 0x19a   :  { %1706 = vmatprep.mubr.msk.f32.mxu0 %vm1916_vm0, %v1917_v4 }
 0x19d   :  { %1707 = vmatmul.mubr.msk.f32.gmra.mrb[60].mxu0 %vm1019_vm2, %v947_v5 }
 0x19e   :  { %1709 = vmatprep.mubr.msk.f32.mxu0 %vm1916_vm0, %v1917_v4 }
 0x1a1   :  { %1710 = vmatmul.mubr.msk.f32.gmra.mrb[62].mxu0 %vm1019_vm2, %v948_v6 }
 0x1a2   :  { %1712 = vmatprep.mubr.msk.f32.mxu0 %vm1916_vm0, %v1917_v4 }
 0x1a5   :  { %1713 = vmatmul.mubr.msk.f32.gmra.mrb[64].mxu0 %vm1019_vm2, %v949_v7 }
 0x1a6   :  { %1715 = vmatprep.mubr.msk.f32.mxu0 %vm1916_vm0, %v1917_v4 }
 0x1a9   :  { %1716 = vmatmul.mubr.msk.f32.gmra.mrb[66].mxu0 %vm1019_vm2, %v950_v35  ;;  %v1185_v35 = vld [vmem:[%s2843_s5 + $0x8] sm:$0x3] }
 0x1aa   :  { %1718 = vmatprep.mubr.msk.f32.mxu0 %vm1916_vm0, %v1917_v4 }
 0x1ad   :  { %1719 = vmatmul.mubr.msk.f32.gmra.mrb[68].mxu0 %vm1019_vm2, %v951_v9  ;;  %v1196_v9 = vpop.permute.xlu1 %1195 }
 0x1ae   :  { %1721 = vmatprep.mubr.msk.f32.mxu0 %vm1916_vm0, %v1917_v4 }
 0x1b1   :  { %1722 = vmatmul.mubr.msk.f32.gmra.mrb[70].mxu0 %vm1019_vm2, %v952_v10 }
 0x25c   :  { %v1119_v14 = vpop.f32.mrb[50].mxu0 }
 0x25d   :  { %v1693_v15 = vpop.f32.mrb[51].mxu0  ;;  %v1120_v18 = vadd.f32 %v1119_v14, %v967_v16 }
 0x25f   :  { %v1173_v20 = vmax.f32 %v1120_v18, 0.0 }
 0x260   :  { %v1124_v43 = vpop.f32.mrb[52].mxu0 }
 0x261   :  { %v1125_v4 = vadd.f32 %v1124_v43, %v972_v45  ;;  %v1696_v19 = vpop.f32.mrb[53].mxu0 }
 0x263   :  { %v1174_v21 = vmax.f32 %v1125_v4, 0.0 }
 0x264   :  { %v1129_v22 = vpop.f32.mrb[54].mxu0 }
 0x265   :  { %v1872_v24 = vpack.c.bf16 %v1174_v21, %v1173_v20  ;;  %v1699_v25 = vpop.f32.mrb[55].mxu0  ;;  %v1130_v55 = vadd.f32 %v1129_v22, %v977_v52 }
 0x267   :  { %1873 = vmatprep.subr.bf16.mxu1 %v1872_v24  ;;  %v1175_v31 = vmax.f32 %v1130_v55, 0.0 }
 0x268   :  { %v1134_v28 = vpop.f32.mrb[56].mxu0  ;;  %1875 = vmatpush3.bf16.msra.mxu1 %v1872_v24 }
 0x269   :  { %v1135_v29 = vadd.f32 %v1134_v28, %v982_v27  ;;  %v1702_v30 = vpop.f32.mrb[57].mxu0 }
 0x26b   :  { %v1176_v2 = vmax.f32 %v1135_v29, 0.0 }
 0x26c   :  { %v1139_v32 = vpop.f32.mrb[58].mxu0 }
 0x26d   :  { %v1876_v62 = vpack.c.bf16 %v1176_v2, %v1175_v31  ;;  %v1705_v34 = vpop.f32.mrb[59].mxu0  ;;  %v1140_v37 = vadd.f32 %v1139_v32, %v987_v36 }
 0x26f   :  { %1877 = vmatprep.subr.bf16.mxu1 %v1876_v62  ;;  %v1177_v41 = vmax.f32 %v1140_v37, 0.0 }
 0x270   :  { %v1144_v39 = vpop.f32.mrb[60].mxu0  ;;  %1879 = vmatpush3.bf16.msra.mxu1 %v1876_v62 }
 0x271   :  { %v1145_v40 = vadd.f32 %v1144_v39, %v992_v38  ;;  %v1708_v8 = vpop.f32.mrb[61].mxu0 }
 0x273   :  { %v1178_v42 = vmax.f32 %v1145_v40, 0.0 }
 0x274   :  { %v1149_v44 = vpop.f32.mrb[62].mxu0 }
 0x275   :  { %v1880_v46 = vpack.c.bf16 %v1178_v42, %v1177_v41  ;;  %v1711_v47 = vpop.f32.mrb[63].mxu0  ;;  %v1150_v49 = vadd.f32 %v1149_v44, %v997_v48 }
 0x277   :  { %1881 = vmatprep.subr.bf16.mxu1 %v1880_v46  ;;  %v1179_v54 = vmax.f32 %v1150_v49, 0.0 }
 0x278   :  { %v1154_v17 = vpop.f32.mrb[64].mxu0  ;;  %1883 = vmatpush3.bf16.msra.mxu1 %v1880_v46 }
 0x279   :  { %v1155_v51 = vadd.f32 %v1154_v17, %v1002_v50  ;;  %v1714_v53 = vpop.f32.mrb[65].mxu0 }
 0x27b   :  { %v1180_v57 = vmax.f32 %v1155_v51, 0.0 }
 0x27c   :  { %v1159_v1 = vpop.f32.mrb[66].mxu0 }
 0x27d   :  { %v1884_v58 = vpack.c.bf16 %v1180_v57, %v1179_v54  ;;  %v1717_v59 = vpop.f32.mrb[67].mxu0  ;;  %v1160_v26 = vadd.f32 %v1159_v1, %v1007_v60 }
 0x27f   :  { %1885 = vmatprep.subr.bf16.mxu1 %v1884_v58  ;;  %v1181_v13 = vmax.f32 %v1160_v26, 0.0 }
 0x280   :  { %v1164_v12 = vpop.f32.mrb[68].mxu0  ;;  %1887 = vmatpush3.bf16.msra.mxu1 %v1884_v58 }
 0x281   :  { %v1165_v63 = vadd.f32 %v1164_v12, %v1012_v61  ;;  %v1720_v0 = vpop.f32.mrb[69].mxu0 }
 0x283   :  { %v1182_v56 = vmax.f32 %v1165_v63, 0.0 }
 0x284   :  { %v1169_v33 = vpop.f32.mrb[70].mxu0 }
 0x285   :  { %v1888_v3 = vpack.c.bf16 %v1182_v56, %v1181_v13  ;;  %v1170_v5 = vadd.f32 %v1169_v33, %v1017_v23  ;;  %v1723_v6 = vpop.f32.mrb[71].mxu0 }
 0x287   :  { %v1183_v7 = vmax.f32 %v1170_v5, 0.0  ;;  %1889 = vmatprep.subr.bf16.mxu1 %v1888_v3 }
 0x288   :  { %1891 = vmatpush3.bf16.msra.mxu1 %v1888_v3 }
 0x289   :  { %1744 = vmatprep.subr.msk.mxu1 %vm1205_vm4, %v1183_v7 }
 0x28c   :  { %1745 = vmatpush3.msk.msra.mxu1 %vm1205_vm4, %v1183_v7 }
 0x28d   :  { %1747 = vmatmul.mubr.msk.f32.vlgmr.msra.gmra.mrb[70].mxu1 %vm1198_vm3, %v1185_v35 }
 0x360   :  { %v1748_v10 = vpop.f32.mrb[70].mxu1 }
 0x361   :  { %v1281_v14 = vadd.f32 %v1748_v10, %v1196_v9  ;;  %v1275_v15 = vpop.f32.mrb[71].mxu1 }
 0x362   :  { %v1276_v16 = vadd.f32 %v1275_v15, %v1191_v11 }
 0x363   :  { %1285 = vst [vmem:[%s2844_s7 + $0x8] sm:$0x3] %v1281_v14 }
 0x364   :  { %1284 = vst [vmem:[%s2844_s7] sm:$0xff] %v1276_v16 }

</bundles_post_ra>
